<compile_context>
chip_gen: v7x
topology: tpu7x:2x2x1
jax: 0.10.0
libtpu: 0.0.40
codegen_flags: <defaults>
</compile_context>

<pallas_src>
import functools
import math

import jax
import jax.numpy as jnp
from jax.experimental import pallas as pl
from jax.experimental.pallas import tpu as pltpu


# ---------------- in-kernel helpers ----------------

def _layernorm_f32(x32, w32, b32, eps=1e-5):
    mu = jnp.mean(x32, axis=-1, keepdims=True)
    xc = x32 - mu
    var = jnp.mean(xc * xc, axis=-1, keepdims=True)
    return xc * jax.lax.rsqrt(var + eps) * w32 + b32


def _attn_heads(q_in, k_ref, v_ref, wq_ref, bq_ref, wo_ref, n_heads, acc_ref):
    """q_in: [TQ, D] (compute dtype).  k_ref/v_ref: (1, H, Lk, E) head-major refs.
    wq_ref: (H, D, E) with the 1/sqrt(E) scale pre-folded, bq_ref: (H, 1, E),
    wo_ref: (H, E, D).  Accumulates sum_h softmax(q_h k_h^T) v_h @ Wo_h into
    acc_ref (f32 [TQ, D]).  All head slices are leading-axis ref slices (lane-dense)."""
    cdt = q_in.dtype
    for h in range(n_heads):                                   # small static unroll
        qh = (jnp.dot(q_in, wq_ref[h], preferred_element_type=jnp.float32)
              + bq_ref[h].astype(jnp.float32)).astype(cdt)     # [TQ, E] (already scaled)
        kh = k_ref[0, h]                                       # [Lk, E]
        s = jax.lax.dot_general(qh, kh, dimension_numbers=(((1,), (1,)), ((), ())),
                                preferred_element_type=jnp.float32)   # [TQ, Lk]
        m = jnp.max(s, axis=-1, keepdims=True)
        e = jnp.exp(s - m)
        p = e * pl.reciprocal(jnp.sum(e, axis=-1, keepdims=True), approx=True)
        oh = jnp.dot(p.astype(cdt), v_ref[0, h],
                     preferred_element_type=jnp.float32).astype(cdt)  # [TQ, E]
        contrib = jnp.dot(oh, wo_ref[h], preferred_element_type=jnp.float32)  # [TQ, D]
        if h == 0:
            acc_ref[...] = contrib
        else:
            acc_ref[...] += contrib


# ---------------- fused decoder-layer kernel ----------------

def decoder_layer_kernel(n_heads, n_ff_chunks,
                         x_ref, ks_ref, vs_ref, kc_ref, vc_ref,
                         swq_ref, sbq_ref, swo_ref, sbo_ref,
                         cwq_ref, cbq_ref, cwo_ref, cbo_ref,
                         w1_ref, b1_ref, w2_ref, b2_ref,
                         lnw_ref, lnb_ref,
                         out_ref, h_sc, acc_sc):
    x_q = x_ref[0]                                   # [TQ, D] query / residual tile
    cdt = x_q.dtype
    lnw = lnw_ref[...].astype(jnp.float32)
    lnb = lnb_ref[...].astype(jnp.float32)

    # x = norm1(x + self_attention(x, x, x))          (dropout = identity, eval)
    _attn_heads(x_q, ks_ref, vs_ref, swq_ref, sbq_ref, swo_ref, n_heads, acc_sc)
    attn = acc_sc[...] + sbo_ref[...].astype(jnp.float32)
    h_sc[...] = _layernorm_f32(x_q.astype(jnp.float32) + attn, lnw[0], lnb[0])

    # x = norm2(x + cross_attention(x, cross, cross))
    _attn_heads(h_sc[...].astype(cdt), kc_ref, vc_ref, cwq_ref, cbq_ref, cwo_ref,
                n_heads, acc_sc)
    attn = acc_sc[...] + cbo_ref[...].astype(jnp.float32)
    h_sc[...] = _layernorm_f32(h_sc[...] + attn, lnw[1], lnb[1])

    # y = conv2(relu(conv1(x^T)))^T   (kernel_size=1 conv == per-position matmul),
    # computed in d_ff chunks (leading-axis ref slices) with the f32 scratch accumulator.
    hq = h_sc[...].astype(cdt)
    for c in range(n_ff_chunks):
        t = (jnp.dot(hq, w1_ref[c], preferred_element_type=jnp.float32)
             + b1_ref[c].astype(jnp.float32))
        t = jnp.maximum(t, 0.0)   # TODO(synk): activation='gelu' variant not implemented
        contrib = jnp.dot(t.astype(cdt), w2_ref[c], preferred_element_type=jnp.float32)
        if c == 0:
            acc_sc[...] = contrib
        else:
            acc_sc[...] += contrib
    ff = acc_sc[...] + b2_ref[...].astype(jnp.float32)

    out_ref[0] = _layernorm_f32(h_sc[...] + ff, lnw[2], lnb[2]).astype(out_ref.dtype)


# ---------------- wrapper ----------------

def _round_up(a, m):
    return -(-a // m) * m


def decoder_layer(x, cross, params, n_heads, *, q_tile=128, ff_chunk_max=1024):
    """x: [B, L, D] decoder stream; cross: [B, S, D] encoder output."""
    B, L, D = x.shape
    S = cross.shape[1]
    assert D % n_heads == 0
    E = D // n_heads
    d_ff = params["w1"].shape[-1]
    cdt = x.dtype

    # ---- tiles (pad L to a multiple of TQ; never degrade to TQ = L for odd L) ----
    TQ = q_tile if L >= q_tile else _round_up(L, 8)
    L_pad = _round_up(L, TQ)
    nQ = L_pad // TQ
    ff_chunk = ff_chunk_max if d_ff % ff_chunk_max == 0 else d_ff
    n_ch = d_ff // ff_chunk

    # ---- hoisted K/V projections (plain XLA), head-major [B, H, Lk, E] ----
    sW, sb, cW, cb = params["sW"], params["sb"], params["cW"], params["cb"]

    def kv_proj(src, w, b):
        kv = src @ w + b                                             # [B, Lk, D]
        Lk = src.shape[1]
        return kv.reshape(B, Lk, n_heads, E).transpose(0, 2, 1, 3).astype(cdt)

    k_self, v_self = kv_proj(x, sW[1], sb[1]), kv_proj(x, sW[2], sb[2])
    k_cross, v_cross = kv_proj(cross, cW[1], cb[1]), kv_proj(cross, cW[2], cb[2])

    # ---- head-major attention weights; fold the 1/sqrt(E) scale into Wq/bq ----
    scale = 1.0 / math.sqrt(E)

    def q_pack(w, b):
        wq = (w * scale).reshape(D, n_heads, E).transpose(1, 0, 2)   # [H, D, E]
        bq = (b * scale).reshape(1, n_heads, E).transpose(1, 0, 2)   # [H, 1, E]
        return wq.astype(cdt), bq.astype(cdt)

    swq, sbq = q_pack(sW[0], sb[0])
    cwq, cbq = q_pack(cW[0], cb[0])
    swo = sW[3].reshape(n_heads, E, D).astype(cdt)                   # [H, E, D]
    cwo = cW[3].reshape(n_heads, E, D).astype(cdt)
    sbo = sb[3].astype(cdt)
    cbo = cb[3].astype(cdt)

    # ---- FFN weights pre-chunked so chunk slices are leading-axis ref slices ----
    w1c = params["w1"].reshape(D, n_ch, ff_chunk).transpose(1, 0, 2).astype(cdt)
    b1c = params["b1"].reshape(1, n_ch, ff_chunk).transpose(1, 0, 2).astype(cdt)
    w2c = params["w2"].reshape(n_ch, ff_chunk, D).astype(cdt)
    b2 = params["b2"].astype(cdt)
    lnw = params["lnw"].astype(cdt)
    lnb = params["lnb"].astype(cdt)

    # ---- pad the query/residual stream (padded rows never feed K/V, sliced off later) ----
    x_q_in = x if L_pad == L else jnp.pad(x, ((0, 0), (0, L_pad - L), (0, 0)))

    # ---- VMEM budget from the actual footprint (double-buffered pipeline + f32 scratch) ----
    itm = jnp.dtype(cdt).itemsize
    n_el = 2 * TQ * D                          # x tile + out tile
    n_el += 2 * (L + S) * D                    # K/V (self + cross), head-major
    n_el += 2 * (2 * D * D + 2 * D)            # attention weights/biases (self + cross)
    n_el += 2 * D * d_ff + d_ff + D            # FFN
    n_el += 6 * D                              # LayerNorms
    need = 2 * n_el * itm + 2 * TQ * D * 4 + (4 << 20)
    vmem_limit = int(min(100 << 20, max(32 << 20, need)))

    def full(shape):
        nd = len(shape)
        return pl.BlockSpec(shape, lambda b, q, _nd=nd: (0,) * _nd)

    kernel = functools.partial(decoder_layer_kernel, n_heads, n_ch)
    out = pl.pallas_call(
        kernel,
        out_shape=jax.ShapeDtypeStruct((B, L_pad, D), cdt),
        grid=(B, nQ),
        in_specs=[
            pl.BlockSpec((1, TQ, D), lambda b, q: (b, q, 0)),               # query tile
            pl.BlockSpec((1, n_heads, L, E), lambda b, q: (b, 0, 0, 0)),    # K self (resident)
            pl.BlockSpec((1, n_heads, L, E), lambda b, q: (b, 0, 0, 0)),    # V self
            pl.BlockSpec((1, n_heads, S, E), lambda b, q: (b, 0, 0, 0)),    # K cross
            pl.BlockSpec((1, n_heads, S, E), lambda b, q: (b, 0, 0, 0)),    # V cross
            full((n_heads, D, E)), full((n_heads, 1, E)),                   # self Wq, bq (scaled)
            full((n_heads, E, D)), full((1, D)),                            # self Wo, bo
            full((n_heads, D, E)), full((n_heads, 1, E)),                   # cross Wq, bq (scaled)
            full((n_heads, E, D)), full((1, D)),                            # cross Wo, bo
            full((n_ch, D, ff_chunk)), full((n_ch, 1, ff_chunk)),           # conv1 (k=1)
            full((n_ch, ff_chunk, D)), full((1, D)),                        # conv2 (k=1)
            full((3, 1, D)), full((3, 1, D)),                               # norm1/2/3 w, b
        ],
        out_specs=pl.BlockSpec((1, TQ, D), lambda b, q: (b, q, 0)),
        scratch_shapes=[pltpu.VMEM((TQ, D), jnp.float32),                   # residual stream h
                        pltpu.VMEM((TQ, D), jnp.float32)],                  # attn / FFN accum
        compiler_params=pltpu.CompilerParams(
            dimension_semantics=("parallel", "parallel"),
            vmem_limit_bytes=vmem_limit),
    )(x_q_in, k_self, v_self, k_cross, v_cross,
      swq, sbq, swo, sbo, cwq, cbq, cwo, cbo,
      w1c, b1c, w2c, b2, lnw, lnb)
    return out if L_pad == L else out[:, :L, :]


# ---------------- pure-JAX reference ----------------

def reference(x, cross, params, n_heads):
    def mha(xq, xkv, W, b):
        D = xq.shape[-1]
        E = D // n_heads
        q = xq @ W[0] + b[0]
        k = xkv @ W[1] + b[1]
        v = xkv @ W[2] + b[2]
        Bb, Lq, _ = q.shape
        Lk = k.shape[1]
        qh = q.reshape(Bb, Lq, n_heads, E)
        kh = k.reshape(Bb, Lk, n_heads, E)
        vh = v.reshape(Bb, Lk, n_heads, E)
        s = jnp.einsum("blhe,bmhe->bhlm", qh, kh) / math.sqrt(E)
        p = jax.nn.softmax(s, axis=-1)
        o = jnp.einsum("bhlm,bmhe->blhe", p, vh).reshape(Bb, Lq, D)
        return o @ W[3] + b[3]

    def ln(z, w, b):
        mu = z.mean(-1, keepdims=True)
        var = ((z - mu) ** 2).mean(-1, keepdims=True)
        return (z - mu) / jnp.sqrt(var + 1e-5) * w + b

    x = x + mha(x, x, params["sW"], params["sb"])
    x = ln(x, params["lnw"][0], params["lnb"][0])
    x = x + mha(x, cross, params["cW"], params["cb"])
    x = ln(x, params["lnw"][1], params["lnb"][1])
    y = jnp.maximum(x @ params["w1"] + params["b1"], 0.0)
    y = y @ params["w2"] + params["b2"]
    return ln(x + y, params["lnw"][2], params["lnb"][2])


# ---------------- main ----------------

if __name__ == "__main__":
    B, L, S, D, H = 2, 8, 16, 32, 4   # S != L exercises the differing encoder length path
    d_ff = 4 * D                      # default d_ff = 4 * d_model

    key = jax.random.PRNGKey(0)
    keys = jax.random.split(key, 12)

    def rnd(k, shape, scale=0.05):
        return (scale * jax.random.normal(k, shape)).astype(jnp.float32)

    params = {
        "sW": rnd(keys[0], (4, D, D)),
        "sb": rnd(keys[1], (4, 1, D)),
        "cW": rnd(keys[2], (4, D, D)),
        "cb": rnd(keys[3], (4, 1, D)),
        "w1": rnd(keys[4], (D, d_ff)),
        "b1": rnd(keys[5], (1, d_ff)),
        "w2": rnd(keys[6], (d_ff, D)),
        "b2": rnd(keys[7], (1, D)),
        # LayerNorm default init: weight = 1, bias = 0
        "lnw": jnp.ones((3, 1, D), jnp.float32),
        "lnb": jnp.zeros((3, 1, D), jnp.float32),
    }

    x = jax.random.normal(keys[8], (B, L, D), jnp.float32)
    cross = jax.random.normal(keys[9], (B, S, D), jnp.float32)

    # f32 correctness check
    out = jax.block_until_ready(decoder_layer(x, cross, params, H))
    ref = reference(x, cross, params, H)
    assert out.shape == (B, L, D)
    assert jnp.allclose(out, ref, rtol=1e-2, atol=1e-2), (
        f"f32 max abs diff {float(jnp.max(jnp.abs(out - ref)))}")

    # odd sequence length exercises the padded query-tile path (L not a multiple of 8)
    L2 = 12
    x2 = jax.random.normal(keys[10], (B, L2, D), jnp.float32)
    out2 = jax.block_until_ready(decoder_layer(x2, cross, params, H))
    ref2 = reference(x2, cross, params, H)
    assert out2.shape == (B, L2, D)
    assert jnp.allclose(out2, ref2, rtol=1e-2, atol=1e-2), (
        f"padded-L max abs diff {float(jnp.max(jnp.abs(out2 - ref2)))}")

    # bf16 storage + MXU path (f32 accumulation / softmax / LayerNorm), checked vs f32 ref
    params_bf16 = {k: v.astype(jnp.bfloat16) for k, v in params.items()}
    out_bf16 = jax.block_until_ready(
        decoder_layer(x.astype(jnp.bfloat16), cross.astype(jnp.bfloat16), params_bf16, H))
    assert out_bf16.shape == (B, L, D)
    out_bf16_f32 = out_bf16.astype(jnp.float32)
    assert bool(jnp.all(jnp.isfinite(out_bf16_f32)))
    assert jnp.allclose(out_bf16_f32, ref, rtol=1e-1, atol=1e-1), (
        f"bf16 max abs diff {float(jnp.max(jnp.abs(out_bf16_f32 - ref)))}")

    print("KERNEL_OK")
</pallas_src>

<mosaic_0001>
module attributes {stable_mosaic.version = 11 : i64} {
  func.func @decoder_layer_kernel(%arg0: i32, %arg1: i32, %arg2: memref<1x8x32xf32, #tpu.memory_space<vmem>>, %arg3: memref<1x4x8x8xf32, #tpu.memory_space<vmem>>, %arg4: memref<1x4x8x8xf32, #tpu.memory_space<vmem>>, %arg5: memref<1x4x16x8xf32, #tpu.memory_space<vmem>>, %arg6: memref<1x4x16x8xf32, #tpu.memory_space<vmem>>, %arg7: memref<4x32x8xf32, #tpu.memory_space<vmem>>, %arg8: memref<4x1x8xf32, #tpu.memory_space<vmem>>, %arg9: memref<4x8x32xf32, #tpu.memory_space<vmem>>, %arg10: memref<1x32xf32, #tpu.memory_space<vmem>>, %arg11: memref<4x32x8xf32, #tpu.memory_space<vmem>>, %arg12: memref<4x1x8xf32, #tpu.memory_space<vmem>>, %arg13: memref<4x8x32xf32, #tpu.memory_space<vmem>>, %arg14: memref<1x32xf32, #tpu.memory_space<vmem>>, %arg15: memref<1x32x128xf32, #tpu.memory_space<vmem>>, %arg16: memref<1x1x128xf32, #tpu.memory_space<vmem>>, %arg17: memref<1x128x32xf32, #tpu.memory_space<vmem>>, %arg18: memref<1x32xf32, #tpu.memory_space<vmem>>, %arg19: memref<3x1x32xf32, #tpu.memory_space<vmem>>, %arg20: memref<3x1x32xf32, #tpu.memory_space<vmem>>, %arg21: memref<1x8x32xf32, #tpu.memory_space<vmem>>, %arg22: memref<8x32xf32, #tpu.memory_space<vmem>>, %arg23: memref<8x32xf32, #tpu.memory_space<vmem>>) attributes {dimension_semantics = [#tpu.dimension_semantics<parallel>, #tpu.dimension_semantics<parallel>], iteration_bounds = array<i64: 2, 1>, scalar_prefetch = 0 : i64, scratch_operands = 2 : i64, tpu.core_type = #tpu.core_type<tc>, window_params = [{transform_indices = @transform_0, window_bounds = array<i64: 1, 8, 32>}, {transform_indices = @transform_1, window_bounds = array<i64: 1, 4, 8, 8>}, {transform_indices = @transform_2, window_bounds = array<i64: 1, 4, 8, 8>}, {transform_indices = @transform_3, window_bounds = array<i64: 1, 4, 16, 8>}, {transform_indices = @transform_4, window_bounds = array<i64: 1, 4, 16, 8>}, {pipeline_mode = #tpu.pipeline_mode<synchronous>, transform_indices = @transform_5, window_bounds = array<i64: 4, 32, 8>}, {pipeline_mode = #tpu.pipeline_mode<synchronous>, transform_indices = @transform_6, window_bounds = array<i64: 4, 1, 8>}, {pipeline_mode = #tpu.pipeline_mode<synchronous>, transform_indices = @transform_7, window_bounds = array<i64: 4, 8, 32>}, {pipeline_mode = #tpu.pipeline_mode<synchronous>, transform_indices = @transform_8, window_bounds = array<i64: 1, 32>}, {pipeline_mode = #tpu.pipeline_mode<synchronous>, transform_indices = @transform_9, window_bounds = array<i64: 4, 32, 8>}, {pipeline_mode = #tpu.pipeline_mode<synchronous>, transform_indices = @transform_10, window_bounds = array<i64: 4, 1, 8>}, {pipeline_mode = #tpu.pipeline_mode<synchronous>, transform_indices = @transform_11, window_bounds = array<i64: 4, 8, 32>}, {pipeline_mode = #tpu.pipeline_mode<synchronous>, transform_indices = @transform_12, window_bounds = array<i64: 1, 32>}, {pipeline_mode = #tpu.pipeline_mode<synchronous>, transform_indices = @transform_13, window_bounds = array<i64: 1, 32, 128>}, {pipeline_mode = #tpu.pipeline_mode<synchronous>, transform_indices = @transform_14, window_bounds = array<i64: 1, 1, 128>}, {pipeline_mode = #tpu.pipeline_mode<synchronous>, transform_indices = @transform_15, window_bounds = array<i64: 1, 128, 32>}, {pipeline_mode = #tpu.pipeline_mode<synchronous>, transform_indices = @transform_16, window_bounds = array<i64: 1, 32>}, {pipeline_mode = #tpu.pipeline_mode<synchronous>, transform_indices = @transform_17, window_bounds = array<i64: 3, 1, 32>}, {pipeline_mode = #tpu.pipeline_mode<synchronous>, transform_indices = @transform_18, window_bounds = array<i64: 3, 1, 32>}, {transform_indices = @transform_19, window_bounds = array<i64: 1, 8, 32>}]} {
    %c0 = arith.constant 0 : index
    %c0_0 = arith.constant 0 : index
    %c0_1 = arith.constant 0 : index
    %0 = vector.load %arg2[%c0, %c0_0, %c0_1] : memref<1x8x32xf32, #tpu.memory_space<vmem>>, vector<1x8x32xf32>
    %1 = vector.shape_cast %0 : vector<1x8x32xf32> to vector<8x32xf32>
    %c0_2 = arith.constant 0 : index
    %c0_3 = arith.constant 0 : index
    %c0_4 = arith.constant 0 : index
    %2 = vector.load %arg19[%c0_2, %c0_3, %c0_4] : memref<3x1x32xf32, #tpu.memory_space<vmem>>, vector<3x1x32xf32>
    %c0_5 = arith.constant 0 : index
    %c0_6 = arith.constant 0 : index
    %c0_7 = arith.constant 0 : index
    %3 = vector.load %arg20[%c0_5, %c0_6, %c0_7] : memref<3x1x32xf32, #tpu.memory_space<vmem>>, vector<3x1x32xf32>
    %c0_8 = arith.constant 0 : index
    %c0_9 = arith.constant 0 : index
    %c0_10 = arith.constant 0 : index
    %4 = vector.load %arg7[%c0_8, %c0_9, %c0_10] : memref<4x32x8xf32, #tpu.memory_space<vmem>>, vector<1x32x8xf32>
    %5 = vector.shape_cast %4 : vector<1x32x8xf32> to vector<32x8xf32>
    %cst = arith.constant dense<0.000000e+00> : vector<8x8xf32>
    %6 = tpu.matmul %1, %5, %cst {dimension_numbers = #tpu.dot_dimension_numbers<[1], [0], [0], [1], [0, 0, 1, 1], [], []>} : vector<8x32xf32>, vector<32x8xf32>, vector<8x8xf32> -> vector<8x8xf32>
    %c0_11 = arith.constant 0 : index
    %c0_12 = arith.constant 0 : index
    %c0_13 = arith.constant 0 : index
    %7 = vector.load %arg8[%c0_11, %c0_12, %c0_13] : memref<4x1x8xf32, #tpu.memory_space<vmem>>, vector<1x1x8xf32>
    %8 = vector.shape_cast %7 : vector<1x1x8xf32> to vector<1x8xf32>
    %9 = vector.broadcast %8 : vector<1x8xf32> to vector<8x8xf32>
    %10 = arith.addf %6, %9 : vector<8x8xf32>
    %c0_14 = arith.constant 0 : index
    %c0_15 = arith.constant 0 : index
    %c0_16 = arith.constant 0 : index
    %c0_17 = arith.constant 0 : index
    %11 = vector.load %arg3[%c0_14, %c0_15, %c0_16, %c0_17] : memref<1x4x8x8xf32, #tpu.memory_space<vmem>>, vector<1x1x8x8xf32>
    %12 = vector.shape_cast %11 : vector<1x1x8x8xf32> to vector<8x8xf32>
    %cst_18 = arith.constant dense<0.000000e+00> : vector<8x8xf32>
    %13 = tpu.matmul %10, %12, %cst_18 {dimension_numbers = #tpu.dot_dimension_numbers<[1], [1], [0], [0], [0, 0, 1, 0], [], []>} : vector<8x8xf32>, vector<8x8xf32>, vector<8x8xf32> -> vector<8x8xf32>
    %cst_19 = arith.constant dense<0xFF800000> : vector<8xf32>
    %14 = vector.multi_reduction <maximumf>, %13, %cst_19 [1] : vector<8x8xf32> to vector<8xf32>
    %15 = vector.shape_cast %14 : vector<8xf32> to vector<8x1xf32>
    %16 = vector.broadcast %15 : vector<8x1xf32> to vector<8x8xf32>
    %17 = arith.subf %13, %16 : vector<8x8xf32>
    %18 = math.exp %17 : vector<8x8xf32>
    %cst_20 = arith.constant dense<0.000000e+00> : vector<8xf32>
    %19 = vector.multi_reduction <add>, %18, %cst_20 [1] : vector<8x8xf32> to vector<8xf32>
    %20 = vector.shape_cast %19 : vector<8xf32> to vector<8x1xf32>
    %21 = tpu.reciprocal %20 {approx = true} : vector<8x1xf32> -> vector<8x1xf32>
    %22 = vector.broadcast %21 : vector<8x1xf32> to vector<8x8xf32>
    %23 = arith.mulf %18, %22 : vector<8x8xf32>
    %c0_21 = arith.constant 0 : index
    %c0_22 = arith.constant 0 : index
    %c0_23 = arith.constant 0 : index
    %c0_24 = arith.constant 0 : index
    %24 = vector.load %arg4[%c0_21, %c0_22, %c0_23, %c0_24] : memref<1x4x8x8xf32, #tpu.memory_space<vmem>>, vector<1x1x8x8xf32>
    %25 = vector.shape_cast %24 : vector<1x1x8x8xf32> to vector<8x8xf32>
    %cst_25 = arith.constant dense<0.000000e+00> : vector<8x8xf32>
    %26 = tpu.matmul %23, %25, %cst_25 {dimension_numbers = #tpu.dot_dimension_numbers<[1], [0], [0], [1], [0, 0, 1, 1], [], []>} : vector<8x8xf32>, vector<8x8xf32>, vector<8x8xf32> -> vector<8x8xf32>
    %c0_26 = arith.constant 0 : index
    %c0_27 = arith.constant 0 : index
    %c0_28 = arith.constant 0 : index
    %27 = vector.load %arg9[%c0_26, %c0_27, %c0_28] : memref<4x8x32xf32, #tpu.memory_space<vmem>>, vector<1x8x32xf32>
    %28 = vector.shape_cast %27 : vector<1x8x32xf32> to vector<8x32xf32>
    %cst_29 = arith.constant dense<0.000000e+00> : vector<8x32xf32>
    %29 = tpu.matmul %26, %28, %cst_29 {dimension_numbers = #tpu.dot_dimension_numbers<[1], [0], [0], [1], [0, 0, 1, 1], [], []>} : vector<8x8xf32>, vector<8x32xf32>, vector<8x32xf32> -> vector<8x32xf32>
    %c0_30 = arith.constant 0 : index
    %c0_31 = arith.constant 0 : index
    %30 = vector.load %arg23[%c0_30, %c0_31] : memref<8x32xf32, #tpu.memory_space<vmem>>, vector<8x32xf32>
    tpu.vector_store %arg23[%c0_30, %c0_31], %29 {strides = array<i32>} : memref<8x32xf32, #tpu.memory_space<vmem>>, vector<8x32xf32>,
    %c1 = arith.constant 1 : index
    %c0_32 = arith.constant 0 : index
    %c0_33 = arith.constant 0 : index
    %31 = vector.load %arg7[%c1, %c0_32, %c0_33] : memref<4x32x8xf32, #tpu.memory_space<vmem>>, vector<1x32x8xf32>
    %32 = vector.shape_cast %31 : vector<1x32x8xf32> to vector<32x8xf32>
    %cst_34 = arith.constant dense<0.000000e+00> : vector<8x8xf32>
    %33 = tpu.matmul %1, %32, %cst_34 {dimension_numbers = #tpu.dot_dimension_numbers<[1], [0], [0], [1], [0, 0, 1, 1], [], []>} : vector<8x32xf32>, vector<32x8xf32>, vector<8x8xf32> -> vector<8x8xf32>
    %c1_35 = arith.constant 1 : index
    %c0_36 = arith.constant 0 : index
    %c0_37 = arith.constant 0 : index
    %34 = vector.load %arg8[%c1_35, %c0_36, %c0_37] : memref<4x1x8xf32, #tpu.memory_space<vmem>>, vector<1x1x8xf32>
    %35 = vector.shape_cast %34 : vector<1x1x8xf32> to vector<1x8xf32>
    %36 = vector.broadcast %35 : vector<1x8xf32> to vector<8x8xf32>
    %37 = arith.addf %33, %36 : vector<8x8xf32>
    %c0_38 = arith.constant 0 : index
    %c1_39 = arith.constant 1 : index
    %c0_40 = arith.constant 0 : index
    %c0_41 = arith.constant 0 : index
    %38 = vector.load %arg3[%c0_38, %c1_39, %c0_40, %c0_41] : memref<1x4x8x8xf32, #tpu.memory_space<vmem>>, vector<1x1x8x8xf32>
    %39 = vector.shape_cast %38 : vector<1x1x8x8xf32> to vector<8x8xf32>
    %cst_42 = arith.constant dense<0.000000e+00> : vector<8x8xf32>
    %40 = tpu.matmul %37, %39, %cst_42 {dimension_numbers = #tpu.dot_dimension_numbers<[1], [1], [0], [0], [0, 0, 1, 0], [], []>} : vector<8x8xf32>, vector<8x8xf32>, vector<8x8xf32> -> vector<8x8xf32>
    %cst_43 = arith.constant dense<0xFF800000> : vector<8xf32>
    %41 = vector.multi_reduction <maximumf>, %40, %cst_43 [1] : vector<8x8xf32> to vector<8xf32>
    %42 = vector.shape_cast %41 : vector<8xf32> to vector<8x1xf32>
    %43 = vector.broadcast %42 : vector<8x1xf32> to vector<8x8xf32>
    %44 = arith.subf %40, %43 : vector<8x8xf32>
    %45 = math.exp %44 : vector<8x8xf32>
    %cst_44 = arith.constant dense<0.000000e+00> : vector<8xf32>
    %46 = vector.multi_reduction <add>, %45, %cst_44 [1] : vector<8x8xf32> to vector<8xf32>
    %47 = vector.shape_cast %46 : vector<8xf32> to vector<8x1xf32>
    %48 = tpu.reciprocal %47 {approx = true} : vector<8x1xf32> -> vector<8x1xf32>
    %49 = vector.broadcast %48 : vector<8x1xf32> to vector<8x8xf32>
    %50 = arith.mulf %45, %49 : vector<8x8xf32>
    %c0_45 = arith.constant 0 : index
    %c1_46 = arith.constant 1 : index
    %c0_47 = arith.constant 0 : index
    %c0_48 = arith.constant 0 : index
    %51 = vector.load %arg4[%c0_45, %c1_46, %c0_47, %c0_48] : memref<1x4x8x8xf32, #tpu.memory_space<vmem>>, vector<1x1x8x8xf32>
    %52 = vector.shape_cast %51 : vector<1x1x8x8xf32> to vector<8x8xf32>
    %cst_49 = arith.constant dense<0.000000e+00> : vector<8x8xf32>
    %53 = tpu.matmul %50, %52, %cst_49 {dimension_numbers = #tpu.dot_dimension_numbers<[1], [0], [0], [1], [0, 0, 1, 1], [], []>} : vector<8x8xf32>, vector<8x8xf32>, vector<8x8xf32> -> vector<8x8xf32>
    %c1_50 = arith.constant 1 : index
    %c0_51 = arith.constant 0 : index
    %c0_52 = arith.constant 0 : index
    %54 = vector.load %arg9[%c1_50, %c0_51, %c0_52] : memref<4x8x32xf32, #tpu.memory_space<vmem>>, vector<1x8x32xf32>
    %55 = vector.shape_cast %54 : vector<1x8x32xf32> to vector<8x32xf32>
    %cst_53 = arith.constant dense<0.000000e+00> : vector<8x32xf32>
    %56 = tpu.matmul %53, %55, %cst_53 {dimension_numbers = #tpu.dot_dimension_numbers<[1], [0], [0], [1], [0, 0, 1, 1], [], []>} : vector<8x8xf32>, vector<8x32xf32>, vector<8x32xf32> -> vector<8x32xf32>
    %c0_54 = arith.constant 0 : index
    %c0_55 = arith.constant 0 : index
    %57 = vector.load %arg23[%c0_54, %c0_55] : memref<8x32xf32, #tpu.memory_space<vmem>>, vector<8x32xf32>
    %58 = arith.addf %57, %56 : vector<8x32xf32>
    %c0_56 = arith.constant 0 : index
    %c0_57 = arith.constant 0 : index
    %59 = vector.load %arg23[%c0_56, %c0_57] : memref<8x32xf32, #tpu.memory_space<vmem>>, vector<8x32xf32>
    tpu.vector_store %arg23[%c0_56, %c0_57], %58 {strides = array<i32>} : memref<8x32xf32, #tpu.memory_space<vmem>>, vector<8x32xf32>,
    %c2 = arith.constant 2 : index
    %c0_58 = arith.constant 0 : index
    %c0_59 = arith.constant 0 : index
    %60 = vector.load %arg7[%c2, %c0_58, %c0_59] : memref<4x32x8xf32, #tpu.memory_space<vmem>>, vector<1x32x8xf32>
    %61 = vector.shape_cast %60 : vector<1x32x8xf32> to vector<32x8xf32>
    %cst_60 = arith.constant dense<0.000000e+00> : vector<8x8xf32>
    %62 = tpu.matmul %1, %61, %cst_60 {dimension_numbers = #tpu.dot_dimension_numbers<[1], [0], [0], [1], [0, 0, 1, 1], [], []>} : vector<8x32xf32>, vector<32x8xf32>, vector<8x8xf32> -> vector<8x8xf32>
    %c2_61 = arith.constant 2 : index
    %c0_62 = arith.constant 0 : index
    %c0_63 = arith.constant 0 : index
    %63 = vector.load %arg8[%c2_61, %c0_62, %c0_63] : memref<4x1x8xf32, #tpu.memory_space<vmem>>, vector<1x1x8xf32>
    %64 = vector.shape_cast %63 : vector<1x1x8xf32> to vector<1x8xf32>
    %65 = vector.broadcast %64 : vector<1x8xf32> to vector<8x8xf32>
    %66 = arith.addf %62, %65 : vector<8x8xf32>
    %c0_64 = arith.constant 0 : index
    %c2_65 = arith.constant 2 : index
    %c0_66 = arith.constant 0 : index
    %c0_67 = arith.constant 0 : index
    %67 = vector.load %arg3[%c0_64, %c2_65, %c0_66, %c0_67] : memref<1x4x8x8xf32, #tpu.memory_space<vmem>>, vector<1x1x8x8xf32>
    %68 = vector.shape_cast %67 : vector<1x1x8x8xf32> to vector<8x8xf32>
    %cst_68 = arith.constant dense<0.000000e+00> : vector<8x8xf32>
    %69 = tpu.matmul %66, %68, %cst_68 {dimension_numbers = #tpu.dot_dimension_numbers<[1], [1], [0], [0], [0, 0, 1, 0], [], []>} : vector<8x8xf32>, vector<8x8xf32>, vector<8x8xf32> -> vector<8x8xf32>
    %cst_69 = arith.constant dense<0xFF800000> : vector<8xf32>
    %70 = vector.multi_reduction <maximumf>, %69, %cst_69 [1] : vector<8x8xf32> to vector<8xf32>
    %71 = vector.shape_cast %70 : vector<8xf32> to vector<8x1xf32>
    %72 = vector.broadcast %71 : vector<8x1xf32> to vector<8x8xf32>
    %73 = arith.subf %69, %72 : vector<8x8xf32>
    %74 = math.exp %73 : vector<8x8xf32>
    %cst_70 = arith.constant dense<0.000000e+00> : vector<8xf32>
    %75 = vector.multi_reduction <add>, %74, %cst_70 [1] : vector<8x8xf32> to vector<8xf32>
    %76 = vector.shape_cast %75 : vector<8xf32> to vector<8x1xf32>
    %77 = tpu.reciprocal %76 {approx = true} : vector<8x1xf32> -> vector<8x1xf32>
    %78 = vector.broadcast %77 : vector<8x1xf32> to vector<8x8xf32>
    %79 = arith.mulf %74, %78 : vector<8x8xf32>
    %c0_71 = arith.constant 0 : index
    %c2_72 = arith.constant 2 : index
    %c0_73 = arith.constant 0 : index
    %c0_74 = arith.constant 0 : index
    %80 = vector.load %arg4[%c0_71, %c2_72, %c0_73, %c0_74] : memref<1x4x8x8xf32, #tpu.memory_space<vmem>>, vector<1x1x8x8xf32>
    %81 = vector.shape_cast %80 : vector<1x1x8x8xf32> to vector<8x8xf32>
    %cst_75 = arith.constant dense<0.000000e+00> : vector<8x8xf32>
    %82 = tpu.matmul %79, %81, %cst_75 {dimension_numbers = #tpu.dot_dimension_numbers<[1], [0], [0], [1], [0, 0, 1, 1], [], []>} : vector<8x8xf32>, vector<8x8xf32>, vector<8x8xf32> -> vector<8x8xf32>
    %c2_76 = arith.constant 2 : index
    %c0_77 = arith.constant 0 : index
    %c0_78 = arith.constant 0 : index
    %83 = vector.load %arg9[%c2_76, %c0_77, %c0_78] : memref<4x8x32xf32, #tpu.memory_space<vmem>>, vector<1x8x32xf32>
    %84 = vector.shape_cast %83 : vector<1x8x32xf32> to vector<8x32xf32>
    %cst_79 = arith.constant dense<0.000000e+00> : vector<8x32xf32>
    %85 = tpu.matmul %82, %84, %cst_79 {dimension_numbers = #tpu.dot_dimension_numbers<[1], [0], [0], [1], [0, 0, 1, 1], [], []>} : vector<8x8xf32>, vector<8x32xf32>, vector<8x32xf32> -> vector<8x32xf32>
    %c0_80 = arith.constant 0 : index
    %c0_81 = arith.constant 0 : index
    %86 = vector.load %arg23[%c0_80, %c0_81] : memref<8x32xf32, #tpu.memory_space<vmem>>, vector<8x32xf32>
    %87 = arith.addf %86, %85 : vector<8x32xf32>
    %c0_82 = arith.constant 0 : index
    %c0_83 = arith.constant 0 : index
    %88 = vector.load %arg23[%c0_82, %c0_83] : memref<8x32xf32, #tpu.memory_space<vmem>>, vector<8x32xf32>
    tpu.vector_store %arg23[%c0_82, %c0_83], %87 {strides = array<i32>} : memref<8x32xf32, #tpu.memory_space<vmem>>, vector<8x32xf32>,
    %c3 = arith.constant 3 : index
    %c0_84 = arith.constant 0 : index
    %c0_85 = arith.constant 0 : index
    %89 = vector.load %arg7[%c3, %c0_84, %c0_85] : memref<4x32x8xf32, #tpu.memory_space<vmem>>, vector<1x32x8xf32>
    %90 = vector.shape_cast %89 : vector<1x32x8xf32> to vector<32x8xf32>
    %cst_86 = arith.constant dense<0.000000e+00> : vector<8x8xf32>
    %91 = tpu.matmul %1, %90, %cst_86 {dimension_numbers = #tpu.dot_dimension_numbers<[1], [0], [0], [1], [0, 0, 1, 1], [], []>} : vector<8x32xf32>, vector<32x8xf32>, vector<8x8xf32> -> vector<8x8xf32>
    %c3_87 = arith.constant 3 : index
    %c0_88 = arith.constant 0 : index
    %c0_89 = arith.constant 0 : index
    %92 = vector.load %arg8[%c3_87, %c0_88, %c0_89] : memref<4x1x8xf32, #tpu.memory_space<vmem>>, vector<1x1x8xf32>
    %93 = vector.shape_cast %92 : vector<1x1x8xf32> to vector<1x8xf32>
    %94 = vector.broadcast %93 : vector<1x8xf32> to vector<8x8xf32>
    %95 = arith.addf %91, %94 : vector<8x8xf32>
    %c0_90 = arith.constant 0 : index
    %c3_91 = arith.constant 3 : index
    %c0_92 = arith.constant 0 : index
    %c0_93 = arith.constant 0 : index
    %96 = vector.load %arg3[%c0_90, %c3_91, %c0_92, %c0_93] : memref<1x4x8x8xf32, #tpu.memory_space<vmem>>, vector<1x1x8x8xf32>
    %97 = vector.shape_cast %96 : vector<1x1x8x8xf32> to vector<8x8xf32>
    %cst_94 = arith.constant dense<0.000000e+00> : vector<8x8xf32>
    %98 = tpu.matmul %95, %97, %cst_94 {dimension_numbers = #tpu.dot_dimension_numbers<[1], [1], [0], [0], [0, 0, 1, 0], [], []>} : vector<8x8xf32>, vector<8x8xf32>, vector<8x8xf32> -> vector<8x8xf32>
    %cst_95 = arith.constant dense<0xFF800000> : vector<8xf32>
    %99 = vector.multi_reduction <maximumf>, %98, %cst_95 [1] : vector<8x8xf32> to vector<8xf32>
    %100 = vector.shape_cast %99 : vector<8xf32> to vector<8x1xf32>
    %101 = vector.broadcast %100 : vector<8x1xf32> to vector<8x8xf32>
    %102 = arith.subf %98, %101 : vector<8x8xf32>
    %103 = math.exp %102 : vector<8x8xf32>
    %cst_96 = arith.constant dense<0.000000e+00> : vector<8xf32>
    %104 = vector.multi_reduction <add>, %103, %cst_96 [1] : vector<8x8xf32> to vector<8xf32>
    %105 = vector.shape_cast %104 : vector<8xf32> to vector<8x1xf32>
    %106 = tpu.reciprocal %105 {approx = true} : vector<8x1xf32> -> vector<8x1xf32>
    %107 = vector.broadcast %106 : vector<8x1xf32> to vector<8x8xf32>
    %108 = arith.mulf %103, %107 : vector<8x8xf32>
    %c0_97 = arith.constant 0 : index
    %c3_98 = arith.constant 3 : index
    %c0_99 = arith.constant 0 : index
    %c0_100 = arith.constant 0 : index
    %109 = vector.load %arg4[%c0_97, %c3_98, %c0_99, %c0_100] : memref<1x4x8x8xf32, #tpu.memory_space<vmem>>, vector<1x1x8x8xf32>
    %110 = vector.shape_cast %109 : vector<1x1x8x8xf32> to vector<8x8xf32>
    %cst_101 = arith.constant dense<0.000000e+00> : vector<8x8xf32>
    %111 = tpu.matmul %108, %110, %cst_101 {dimension_numbers = #tpu.dot_dimension_numbers<[1], [0], [0], [1], [0, 0, 1, 1], [], []>} : vector<8x8xf32>, vector<8x8xf32>, vector<8x8xf32> -> vector<8x8xf32>
    %c3_102 = arith.constant 3 : index
    %c0_103 = arith.constant 0 : index
    %c0_104 = arith.constant 0 : index
    %112 = vector.load %arg9[%c3_102, %c0_103, %c0_104] : memref<4x8x32xf32, #tpu.memory_space<vmem>>, vector<1x8x32xf32>
    %113 = vector.shape_cast %112 : vector<1x8x32xf32> to vector<8x32xf32>
    %cst_105 = arith.constant dense<0.000000e+00> : vector<8x32xf32>
    %114 = tpu.matmul %111, %113, %cst_105 {dimension_numbers = #tpu.dot_dimension_numbers<[1], [0], [0], [1], [0, 0, 1, 1], [], []>} : vector<8x8xf32>, vector<8x32xf32>, vector<8x32xf32> -> vector<8x32xf32>
    %c0_106 = arith.constant 0 : index
    %c0_107 = arith.constant 0 : index
    %115 = vector.load %arg23[%c0_106, %c0_107] : memref<8x32xf32, #tpu.memory_space<vmem>>, vector<8x32xf32>
    %116 = arith.addf %115, %114 : vector<8x32xf32>
    %c0_108 = arith.constant 0 : index
    %c0_109 = arith.constant 0 : index
    %117 = vector.load %arg23[%c0_108, %c0_109] : memref<8x32xf32, #tpu.memory_space<vmem>>, vector<8x32xf32>
    tpu.vector_store %arg23[%c0_108, %c0_109], %116 {strides = array<i32>} : memref<8x32xf32, #tpu.memory_space<vmem>>, vector<8x32xf32>,
    %c0_110 = arith.constant 0 : index
    %c0_111 = arith.constant 0 : index
    %118 = vector.load %arg23[%c0_110, %c0_111] : memref<8x32xf32, #tpu.memory_space<vmem>>, vector<8x32xf32>
    %c0_112 = arith.constant 0 : index
    %c0_113 = arith.constant 0 : index
    %119 = vector.load %arg10[%c0_112, %c0_113] : memref<1x32xf32, #tpu.memory_space<vmem>>, vector<1x32xf32>
    %120 = vector.broadcast %119 : vector<1x32xf32> to vector<8x32xf32>
    %121 = arith.addf %118, %120 : vector<8x32xf32>
    %122 = arith.addf %1, %121 : vector<8x32xf32>
    %123 = vector.extract_strided_slice %2 {offsets = [0, 0, 0], sizes = [1, 1, 32], strides = [1, 1, 1]} : vector<3x1x32xf32> to vector<1x1x32xf32>
    %124 = vector.shape_cast %123 : vector<1x1x32xf32> to vector<1x32xf32>
    %125 = vector.extract_strided_slice %3 {offsets = [0, 0, 0], sizes = [1, 1, 32], strides = [1, 1, 1]} : vector<3x1x32xf32> to vector<1x1x32xf32>
    %126 = vector.shape_cast %125 : vector<1x1x32xf32> to vector<1x32xf32>
    %cst_114 = arith.constant dense<0.000000e+00> : vector<8xf32>
    %127 = vector.multi_reduction <add>, %122, %cst_114 [1] : vector<8x32xf32> to vector<8xf32>
    %128 = vector.shape_cast %127 : vector<8xf32> to vector<8x1xf32>
    %cst_115 = arith.constant 3.200000e+01 : f32
    %129 = vector.broadcast %cst_115 : f32 to vector<8x1xf32>
    %130 = arith.divf %128, %129 : vector<8x1xf32>
    %131 = vector.broadcast %130 : vector<8x1xf32> to vector<8x32xf32>
    %132 = arith.subf %122, %131 : vector<8x32xf32>
    %133 = arith.mulf %132, %132 : vector<8x32xf32>
    %cst_116 = arith.constant dense<0.000000e+00> : vector<8xf32>
    %134 = vector.multi_reduction <add>, %133, %cst_116 [1] : vector<8x32xf32> to vector<8xf32>
    %135 = vector.shape_cast %134 : vector<8xf32> to vector<8x1xf32>
    %cst_117 = arith.constant 3.200000e+01 : f32
    %136 = vector.broadcast %cst_117 : f32 to vector<8x1xf32>
    %137 = arith.divf %135, %136 : vector<8x1xf32>
    %cst_118 = arith.constant 9.99999974E-6 : f32
    %138 = vector.broadcast %cst_118 : f32 to vector<8x1xf32>
    %139 = arith.addf %137, %138 : vector<8x1xf32>
    %140 = math.rsqrt %139 : vector<8x1xf32>
    %141 = vector.broadcast %140 : vector<8x1xf32> to vector<8x32xf32>
    %142 = arith.mulf %132, %141 : vector<8x32xf32>
    %143 = vector.broadcast %124 : vector<1x32xf32> to vector<8x32xf32>
    %144 = arith.mulf %142, %143 : vector<8x32xf32>
    %145 = vector.broadcast %126 : vector<1x32xf32> to vector<8x32xf32>
    %146 = arith.addf %144, %145 : vector<8x32xf32>
    %c0_119 = arith.constant 0 : index
    %c0_120 = arith.constant 0 : index
    %147 = vector.load %arg22[%c0_119, %c0_120] : memref<8x32xf32, #tpu.memory_space<vmem>>, vector<8x32xf32>
    tpu.vector_store %arg22[%c0_119, %c0_120], %146 {strides = array<i32>} : memref<8x32xf32, #tpu.memory_space<vmem>>, vector<8x32xf32>,
    %c0_121 = arith.constant 0 : index
    %c0_122 = arith.constant 0 : index
    %148 = vector.load %arg22[%c0_121, %c0_122] : memref<8x32xf32, #tpu.memory_space<vmem>>, vector<8x32xf32>
    %c0_123 = arith.constant 0 : index
    %c0_124 = arith.constant 0 : index
    %c0_125 = arith.constant 0 : index
    %149 = vector.load %arg11[%c0_123, %c0_124, %c0_125] : memref<4x32x8xf32, #tpu.memory_space<vmem>>, vector<1x32x8xf32>
    %150 = vector.shape_cast %149 : vector<1x32x8xf32> to vector<32x8xf32>
    %cst_126 = arith.constant dense<0.000000e+00> : vector<8x8xf32>
    %151 = tpu.matmul %148, %150, %cst_126 {dimension_numbers = #tpu.dot_dimension_numbers<[1], [0], [0], [1], [0, 0, 1, 1], [], []>} : vector<8x32xf32>, vector<32x8xf32>, vector<8x8xf32> -> vector<8x8xf32>
    %c0_127 = arith.constant 0 : index
    %c0_128 = arith.constant 0 : index
    %c0_129 = arith.constant 0 : index
    %152 = vector.load %arg12[%c0_127, %c0_128, %c0_129] : memref<4x1x8xf32, #tpu.memory_space<vmem>>, vector<1x1x8xf32>
    %153 = vector.shape_cast %152 : vector<1x1x8xf32> to vector<1x8xf32>
    %154 = vector.broadcast %153 : vector<1x8xf32> to vector<8x8xf32>
    %155 = arith.addf %151, %154 : vector<8x8xf32>
    %c0_130 = arith.constant 0 : index
    %c0_131 = arith.constant 0 : index
    %c0_132 = arith.constant 0 : index
    %c0_133 = arith.constant 0 : index
    %156 = vector.load %arg5[%c0_130, %c0_131, %c0_132, %c0_133] : memref<1x4x16x8xf32, #tpu.memory_space<vmem>>, vector<1x1x16x8xf32>
    %157 = vector.shape_cast %156 : vector<1x1x16x8xf32> to vector<16x8xf32>
    %cst_134 = arith.constant dense<0.000000e+00> : vector<8x16xf32>
    %158 = tpu.matmul %155, %157, %cst_134 {dimension_numbers = #tpu.dot_dimension_numbers<[1], [1], [0], [0], [0, 0, 1, 0], [], []>} : vector<8x8xf32>, vector<16x8xf32>, vector<8x16xf32> -> vector<8x16xf32>
    %cst_135 = arith.constant dense<0xFF800000> : vector<8xf32>
    %159 = vector.multi_reduction <maximumf>, %158, %cst_135 [1] : vector<8x16xf32> to vector<8xf32>
    %160 = vector.shape_cast %159 : vector<8xf32> to vector<8x1xf32>
    %161 = vector.broadcast %160 : vector<8x1xf32> to vector<8x16xf32>
    %162 = arith.subf %158, %161 : vector<8x16xf32>
    %163 = math.exp %162 : vector<8x16xf32>
    %cst_136 = arith.constant dense<0.000000e+00> : vector<8xf32>
    %164 = vector.multi_reduction <add>, %163, %cst_136 [1] : vector<8x16xf32> to vector<8xf32>
    %165 = vector.shape_cast %164 : vector<8xf32> to vector<8x1xf32>
    %166 = tpu.reciprocal %165 {approx = true} : vector<8x1xf32> -> vector<8x1xf32>
    %167 = vector.broadcast %166 : vector<8x1xf32> to vector<8x16xf32>
    %168 = arith.mulf %163, %167 : vector<8x16xf32>
    %c0_137 = arith.constant 0 : index
    %c0_138 = arith.constant 0 : index
    %c0_139 = arith.constant 0 : index
    %c0_140 = arith.constant 0 : index
    %169 = vector.load %arg6[%c0_137, %c0_138, %c0_139, %c0_140] : memref<1x4x16x8xf32, #tpu.memory_space<vmem>>, vector<1x1x16x8xf32>
    %170 = vector.shape_cast %169 : vector<1x1x16x8xf32> to vector<16x8xf32>
    %cst_141 = arith.constant dense<0.000000e+00> : vector<8x8xf32>
    %171 = tpu.matmul %168, %170, %cst_141 {dimension_numbers = #tpu.dot_dimension_numbers<[1], [0], [0], [1], [0, 0, 1, 1], [], []>} : vector<8x16xf32>, vector<16x8xf32>, vector<8x8xf32> -> vector<8x8xf32>
    %c0_142 = arith.constant 0 : index
    %c0_143 = arith.constant 0 : index
    %c0_144 = arith.constant 0 : index
    %172 = vector.load %arg13[%c0_142, %c0_143, %c0_144] : memref<4x8x32xf32, #tpu.memory_space<vmem>>, vector<1x8x32xf32>
    %173 = vector.shape_cast %172 : vector<1x8x32xf32> to vector<8x32xf32>
    %cst_145 = arith.constant dense<0.000000e+00> : vector<8x32xf32>
    %174 = tpu.matmul %171, %173, %cst_145 {dimension_numbers = #tpu.dot_dimension_numbers<[1], [0], [0], [1], [0, 0, 1, 1], [], []>} : vector<8x8xf32>, vector<8x32xf32>, vector<8x32xf32> -> vector<8x32xf32>
    %c0_146 = arith.constant 0 : index
    %c0_147 = arith.constant 0 : index
    %175 = vector.load %arg23[%c0_146, %c0_147] : memref<8x32xf32, #tpu.memory_space<vmem>>, vector<8x32xf32>
    tpu.vector_store %arg23[%c0_146, %c0_147], %174 {strides = array<i32>} : memref<8x32xf32, #tpu.memory_space<vmem>>, vector<8x32xf32>,
    %c1_148 = arith.constant 1 : index
    %c0_149 = arith.constant 0 : index
    %c0_150 = arith.constant 0 : index
    %176 = vector.load %arg11[%c1_148, %c0_149, %c0_150] : memref<4x32x8xf32, #tpu.memory_space<vmem>>, vector<1x32x8xf32>
    %177 = vector.shape_cast %176 : vector<1x32x8xf32> to vector<32x8xf32>
    %cst_151 = arith.constant dense<0.000000e+00> : vector<8x8xf32>
    %178 = tpu.matmul %148, %177, %cst_151 {dimension_numbers = #tpu.dot_dimension_numbers<[1], [0], [0], [1], [0, 0, 1, 1], [], []>} : vector<8x32xf32>, vector<32x8xf32>, vector<8x8xf32> -> vector<8x8xf32>
    %c1_152 = arith.constant 1 : index
    %c0_153 = arith.constant 0 : index
    %c0_154 = arith.constant 0 : index
    %179 = vector.load %arg12[%c1_152, %c0_153, %c0_154] : memref<4x1x8xf32, #tpu.memory_space<vmem>>, vector<1x1x8xf32>
    %180 = vector.shape_cast %179 : vector<1x1x8xf32> to vector<1x8xf32>
    %181 = vector.broadcast %180 : vector<1x8xf32> to vector<8x8xf32>
    %182 = arith.addf %178, %181 : vector<8x8xf32>
    %c0_155 = arith.constant 0 : index
    %c1_156 = arith.constant 1 : index
    %c0_157 = arith.constant 0 : index
    %c0_158 = arith.constant 0 : index
    %183 = vector.load %arg5[%c0_155, %c1_156, %c0_157, %c0_158] : memref<1x4x16x8xf32, #tpu.memory_space<vmem>>, vector<1x1x16x8xf32>
    %184 = vector.shape_cast %183 : vector<1x1x16x8xf32> to vector<16x8xf32>
    %cst_159 = arith.constant dense<0.000000e+00> : vector<8x16xf32>
    %185 = tpu.matmul %182, %184, %cst_159 {dimension_numbers = #tpu.dot_dimension_numbers<[1], [1], [0], [0], [0, 0, 1, 0], [], []>} : vector<8x8xf32>, vector<16x8xf32>, vector<8x16xf32> -> vector<8x16xf32>
    %cst_160 = arith.constant dense<0xFF800000> : vector<8xf32>
    %186 = vector.multi_reduction <maximumf>, %185, %cst_160 [1] : vector<8x16xf32> to vector<8xf32>
    %187 = vector.shape_cast %186 : vector<8xf32> to vector<8x1xf32>
    %188 = vector.broadcast %187 : vector<8x1xf32> to vector<8x16xf32>
    %189 = arith.subf %185, %188 : vector<8x16xf32>
    %190 = math.exp %189 : vector<8x16xf32>
    %cst_161 = arith.constant dense<0.000000e+00> : vector<8xf32>
    %191 = vector.multi_reduction <add>, %190, %cst_161 [1] : vector<8x16xf32> to vector<8xf32>
    %192 = vector.shape_cast %191 : vector<8xf32> to vector<8x1xf32>
    %193 = tpu.reciprocal %192 {approx = true} : vector<8x1xf32> -> vector<8x1xf32>
    %194 = vector.broadcast %193 : vector<8x1xf32> to vector<8x16xf32>
    %195 = arith.mulf %190, %194 : vector<8x16xf32>
    %c0_162 = arith.constant 0 : index
    %c1_163 = arith.constant 1 : index
    %c0_164 = arith.constant 0 : index
    %c0_165 = arith.constant 0 : index
    %196 = vector.load %arg6[%c0_162, %c1_163, %c0_164, %c0_165] : memref<1x4x16x8xf32, #tpu.memory_space<vmem>>, vector<1x1x16x8xf32>
    %197 = vector.shape_cast %196 : vector<1x1x16x8xf32> to vector<16x8xf32>
    %cst_166 = arith.constant dense<0.000000e+00> : vector<8x8xf32>
    %198 = tpu.matmul %195, %197, %cst_166 {dimension_numbers = #tpu.dot_dimension_numbers<[1], [0], [0], [1], [0, 0, 1, 1], [], []>} : vector<8x16xf32>, vector<16x8xf32>, vector<8x8xf32> -> vector<8x8xf32>
    %c1_167 = arith.constant 1 : index
    %c0_168 = arith.constant 0 : index
    %c0_169 = arith.constant 0 : index
    %199 = vector.load %arg13[%c1_167, %c0_168, %c0_169] : memref<4x8x32xf32, #tpu.memory_space<vmem>>, vector<1x8x32xf32>
    %200 = vector.shape_cast %199 : vector<1x8x32xf32> to vector<8x32xf32>
    %cst_170 = arith.constant dense<0.000000e+00> : vector<8x32xf32>
    %201 = tpu.matmul %198, %200, %cst_170 {dimension_numbers = #tpu.dot_dimension_numbers<[1], [0], [0], [1], [0, 0, 1, 1], [], []>} : vector<8x8xf32>, vector<8x32xf32>, vector<8x32xf32> -> vector<8x32xf32>
    %c0_171 = arith.constant 0 : index
    %c0_172 = arith.constant 0 : index
    %202 = vector.load %arg23[%c0_171, %c0_172] : memref<8x32xf32, #tpu.memory_space<vmem>>, vector<8x32xf32>
    %203 = arith.addf %202, %201 : vector<8x32xf32>
    %c0_173 = arith.constant 0 : index
    %c0_174 = arith.constant 0 : index
    %204 = vector.load %arg23[%c0_173, %c0_174] : memref<8x32xf32, #tpu.memory_space<vmem>>, vector<8x32xf32>
    tpu.vector_store %arg23[%c0_173, %c0_174], %203 {strides = array<i32>} : memref<8x32xf32, #tpu.memory_space<vmem>>, vector<8x32xf32>,
    %c2_175 = arith.constant 2 : index
    %c0_176 = arith.constant 0 : index
    %c0_177 = arith.constant 0 : index
    %205 = vector.load %arg11[%c2_175, %c0_176, %c0_177] : memref<4x32x8xf32, #tpu.memory_space<vmem>>, vector<1x32x8xf32>
    %206 = vector.shape_cast %205 : vector<1x32x8xf32> to vector<32x8xf32>
    %cst_178 = arith.constant dense<0.000000e+00> : vector<8x8xf32>
    %207 = tpu.matmul %148, %206, %cst_178 {dimension_numbers = #tpu.dot_dimension_numbers<[1], [0], [0], [1], [0, 0, 1, 1], [], []>} : vector<8x32xf32>, vector<32x8xf32>, vector<8x8xf32> -> vector<8x8xf32>
    %c2_179 = arith.constant 2 : index
    %c0_180 = arith.constant 0 : index
    %c0_181 = arith.constant 0 : index
    %208 = vector.load %arg12[%c2_179, %c0_180, %c0_181] : memref<4x1x8xf32, #tpu.memory_space<vmem>>, vector<1x1x8xf32>
    %209 = vector.shape_cast %208 : vector<1x1x8xf32> to vector<1x8xf32>
    %210 = vector.broadcast %209 : vector<1x8xf32> to vector<8x8xf32>
    %211 = arith.addf %207, %210 : vector<8x8xf32>
    %c0_182 = arith.constant 0 : index
    %c2_183 = arith.constant 2 : index
    %c0_184 = arith.constant 0 : index
    %c0_185 = arith.constant 0 : index
    %212 = vector.load %arg5[%c0_182, %c2_183, %c0_184, %c0_185] : memref<1x4x16x8xf32, #tpu.memory_space<vmem>>, vector<1x1x16x8xf32>
    %213 = vector.shape_cast %212 : vector<1x1x16x8xf32> to vector<16x8xf32>
    %cst_186 = arith.constant dense<0.000000e+00> : vector<8x16xf32>
    %214 = tpu.matmul %211, %213, %cst_186 {dimension_numbers = #tpu.dot_dimension_numbers<[1], [1], [0], [0], [0, 0, 1, 0], [], []>} : vector<8x8xf32>, vector<16x8xf32>, vector<8x16xf32> -> vector<8x16xf32>
    %cst_187 = arith.constant dense<0xFF800000> : vector<8xf32>
    %215 = vector.multi_reduction <maximumf>, %214, %cst_187 [1] : vector<8x16xf32> to vector<8xf32>
    %216 = vector.shape_cast %215 : vector<8xf32> to vector<8x1xf32>
    %217 = vector.broadcast %216 : vector<8x1xf32> to vector<8x16xf32>
    %218 = arith.subf %214, %217 : vector<8x16xf32>
    %219 = math.exp %218 : vector<8x16xf32>
    %cst_188 = arith.constant dense<0.000000e+00> : vector<8xf32>
    %220 = vector.multi_reduction <add>, %219, %cst_188 [1] : vector<8x16xf32> to vector<8xf32>
    %221 = vector.shape_cast %220 : vector<8xf32> to vector<8x1xf32>
    %222 = tpu.reciprocal %221 {approx = true} : vector<8x1xf32> -> vector<8x1xf32>
    %223 = vector.broadcast %222 : vector<8x1xf32> to vector<8x16xf32>
    %224 = arith.mulf %219, %223 : vector<8x16xf32>
    %c0_189 = arith.constant 0 : index
    %c2_190 = arith.constant 2 : index
    %c0_191 = arith.constant 0 : index
    %c0_192 = arith.constant 0 : index
    %225 = vector.load %arg6[%c0_189, %c2_190, %c0_191, %c0_192] : memref<1x4x16x8xf32, #tpu.memory_space<vmem>>, vector<1x1x16x8xf32>
    %226 = vector.shape_cast %225 : vector<1x1x16x8xf32> to vector<16x8xf32>
    %cst_193 = arith.constant dense<0.000000e+00> : vector<8x8xf32>
    %227 = tpu.matmul %224, %226, %cst_193 {dimension_numbers = #tpu.dot_dimension_numbers<[1], [0], [0], [1], [0, 0, 1, 1], [], []>} : vector<8x16xf32>, vector<16x8xf32>, vector<8x8xf32> -> vector<8x8xf32>
    %c2_194 = arith.constant 2 : index
    %c0_195 = arith.constant 0 : index
    %c0_196 = arith.constant 0 : index
    %228 = vector.load %arg13[%c2_194, %c0_195, %c0_196] : memref<4x8x32xf32, #tpu.memory_space<vmem>>, vector<1x8x32xf32>
    %229 = vector.shape_cast %228 : vector<1x8x32xf32> to vector<8x32xf32>
    %cst_197 = arith.constant dense<0.000000e+00> : vector<8x32xf32>
    %230 = tpu.matmul %227, %229, %cst_197 {dimension_numbers = #tpu.dot_dimension_numbers<[1], [0], [0], [1], [0, 0, 1, 1], [], []>} : vector<8x8xf32>, vector<8x32xf32>, vector<8x32xf32> -> vector<8x32xf32>
    %c0_198 = arith.constant 0 : index
    %c0_199 = arith.constant 0 : index
    %231 = vector.load %arg23[%c0_198, %c0_199] : memref<8x32xf32, #tpu.memory_space<vmem>>, vector<8x32xf32>
    %232 = arith.addf %231, %230 : vector<8x32xf32>
    %c0_200 = arith.constant 0 : index
    %c0_201 = arith.constant 0 : index
    %233 = vector.load %arg23[%c0_200, %c0_201] : memref<8x32xf32, #tpu.memory_space<vmem>>, vector<8x32xf32>
    tpu.vector_store %arg23[%c0_200, %c0_201], %232 {strides = array<i32>} : memref<8x32xf32, #tpu.memory_space<vmem>>, vector<8x32xf32>,
    %c3_202 = arith.constant 3 : index
    %c0_203 = arith.constant 0 : index
    %c0_204 = arith.constant 0 : index
    %234 = vector.load %arg11[%c3_202, %c0_203, %c0_204] : memref<4x32x8xf32, #tpu.memory_space<vmem>>, vector<1x32x8xf32>
    %235 = vector.shape_cast %234 : vector<1x32x8xf32> to vector<32x8xf32>
    %cst_205 = arith.constant dense<0.000000e+00> : vector<8x8xf32>
    %236 = tpu.matmul %148, %235, %cst_205 {dimension_numbers = #tpu.dot_dimension_numbers<[1], [0], [0], [1], [0, 0, 1, 1], [], []>} : vector<8x32xf32>, vector<32x8xf32>, vector<8x8xf32> -> vector<8x8xf32>
    %c3_206 = arith.constant 3 : index
    %c0_207 = arith.constant 0 : index
    %c0_208 = arith.constant 0 : index
    %237 = vector.load %arg12[%c3_206, %c0_207, %c0_208] : memref<4x1x8xf32, #tpu.memory_space<vmem>>, vector<1x1x8xf32>
    %238 = vector.shape_cast %237 : vector<1x1x8xf32> to vector<1x8xf32>
    %239 = vector.broadcast %238 : vector<1x8xf32> to vector<8x8xf32>
    %240 = arith.addf %236, %239 : vector<8x8xf32>
    %c0_209 = arith.constant 0 : index
    %c3_210 = arith.constant 3 : index
    %c0_211 = arith.constant 0 : index
    %c0_212 = arith.constant 0 : index
    %241 = vector.load %arg5[%c0_209, %c3_210, %c0_211, %c0_212] : memref<1x4x16x8xf32, #tpu.memory_space<vmem>>, vector<1x1x16x8xf32>
    %242 = vector.shape_cast %241 : vector<1x1x16x8xf32> to vector<16x8xf32>
    %cst_213 = arith.constant dense<0.000000e+00> : vector<8x16xf32>
    %243 = tpu.matmul %240, %242, %cst_213 {dimension_numbers = #tpu.dot_dimension_numbers<[1], [1], [0], [0], [0, 0, 1, 0], [], []>} : vector<8x8xf32>, vector<16x8xf32>, vector<8x16xf32> -> vector<8x16xf32>
    %cst_214 = arith.constant dense<0xFF800000> : vector<8xf32>
    %244 = vector.multi_reduction <maximumf>, %243, %cst_214 [1] : vector<8x16xf32> to vector<8xf32>
    %245 = vector.shape_cast %244 : vector<8xf32> to vector<8x1xf32>
    %246 = vector.broadcast %245 : vector<8x1xf32> to vector<8x16xf32>
    %247 = arith.subf %243, %246 : vector<8x16xf32>
    %248 = math.exp %247 : vector<8x16xf32>
    %cst_215 = arith.constant dense<0.000000e+00> : vector<8xf32>
    %249 = vector.multi_reduction <add>, %248, %cst_215 [1] : vector<8x16xf32> to vector<8xf32>
    %250 = vector.shape_cast %249 : vector<8xf32> to vector<8x1xf32>
    %251 = tpu.reciprocal %250 {approx = true} : vector<8x1xf32> -> vector<8x1xf32>
    %252 = vector.broadcast %251 : vector<8x1xf32> to vector<8x16xf32>
    %253 = arith.mulf %248, %252 : vector<8x16xf32>
    %c0_216 = arith.constant 0 : index
    %c3_217 = arith.constant 3 : index
    %c0_218 = arith.constant 0 : index
    %c0_219 = arith.constant 0 : index
    %254 = vector.load %arg6[%c0_216, %c3_217, %c0_218, %c0_219] : memref<1x4x16x8xf32, #tpu.memory_space<vmem>>, vector<1x1x16x8xf32>
    %255 = vector.shape_cast %254 : vector<1x1x16x8xf32> to vector<16x8xf32>
    %cst_220 = arith.constant dense<0.000000e+00> : vector<8x8xf32>
    %256 = tpu.matmul %253, %255, %cst_220 {dimension_numbers = #tpu.dot_dimension_numbers<[1], [0], [0], [1], [0, 0, 1, 1], [], []>} : vector<8x16xf32>, vector<16x8xf32>, vector<8x8xf32> -> vector<8x8xf32>
    %c3_221 = arith.constant 3 : index
    %c0_222 = arith.constant 0 : index
    %c0_223 = arith.constant 0 : index
    %257 = vector.load %arg13[%c3_221, %c0_222, %c0_223] : memref<4x8x32xf32, #tpu.memory_space<vmem>>, vector<1x8x32xf32>
    %258 = vector.shape_cast %257 : vector<1x8x32xf32> to vector<8x32xf32>
    %cst_224 = arith.constant dense<0.000000e+00> : vector<8x32xf32>
    %259 = tpu.matmul %256, %258, %cst_224 {dimension_numbers = #tpu.dot_dimension_numbers<[1], [0], [0], [1], [0, 0, 1, 1], [], []>} : vector<8x8xf32>, vector<8x32xf32>, vector<8x32xf32> -> vector<8x32xf32>
    %c0_225 = arith.constant 0 : index
    %c0_226 = arith.constant 0 : index
    %260 = vector.load %arg23[%c0_225, %c0_226] : memref<8x32xf32, #tpu.memory_space<vmem>>, vector<8x32xf32>
    %261 = arith.addf %260, %259 : vector<8x32xf32>
    %c0_227 = arith.constant 0 : index
    %c0_228 = arith.constant 0 : index
    %262 = vector.load %arg23[%c0_227, %c0_228] : memref<8x32xf32, #tpu.memory_space<vmem>>, vector<8x32xf32>
    tpu.vector_store %arg23[%c0_227, %c0_228], %261 {strides = array<i32>} : memref<8x32xf32, #tpu.memory_space<vmem>>, vector<8x32xf32>,
    %c0_229 = arith.constant 0 : index
    %c0_230 = arith.constant 0 : index
    %263 = vector.load %arg23[%c0_229, %c0_230] : memref<8x32xf32, #tpu.memory_space<vmem>>, vector<8x32xf32>
    %c0_231 = arith.constant 0 : index
    %c0_232 = arith.constant 0 : index
    %264 = vector.load %arg14[%c0_231, %c0_232] : memref<1x32xf32, #tpu.memory_space<vmem>>, vector<1x32xf32>
    %265 = vector.broadcast %264 : vector<1x32xf32> to vector<8x32xf32>
    %266 = arith.addf %263, %265 : vector<8x32xf32>
    %c0_233 = arith.constant 0 : index
    %c0_234 = arith.constant 0 : index
    %267 = vector.load %arg22[%c0_233, %c0_234] : memref<8x32xf32, #tpu.memory_space<vmem>>, vector<8x32xf32>
    %268 = arith.addf %267, %266 : vector<8x32xf32>
    %269 = vector.extract_strided_slice %2 {offsets = [1, 0, 0], sizes = [1, 1, 32], strides = [1, 1, 1]} : vector<3x1x32xf32> to vector<1x1x32xf32>
    %270 = vector.shape_cast %269 : vector<1x1x32xf32> to vector<1x32xf32>
    %271 = vector.extract_strided_slice %3 {offsets = [1, 0, 0], sizes = [1, 1, 32], strides = [1, 1, 1]} : vector<3x1x32xf32> to vector<1x1x32xf32>
    %272 = vector.shape_cast %271 : vector<1x1x32xf32> to vector<1x32xf32>
    %cst_235 = arith.constant dense<0.000000e+00> : vector<8xf32>
    %273 = vector.multi_reduction <add>, %268, %cst_235 [1] : vector<8x32xf32> to vector<8xf32>
    %274 = vector.shape_cast %273 : vector<8xf32> to vector<8x1xf32>
    %cst_236 = arith.constant 3.200000e+01 : f32
    %275 = vector.broadcast %cst_236 : f32 to vector<8x1xf32>
    %276 = arith.divf %274, %275 : vector<8x1xf32>
    %277 = vector.broadcast %276 : vector<8x1xf32> to vector<8x32xf32>
    %278 = arith.subf %268, %277 : vector<8x32xf32>
    %279 = arith.mulf %278, %278 : vector<8x32xf32>
    %cst_237 = arith.constant dense<0.000000e+00> : vector<8xf32>
    %280 = vector.multi_reduction <add>, %279, %cst_237 [1] : vector<8x32xf32> to vector<8xf32>
    %281 = vector.shape_cast %280 : vector<8xf32> to vector<8x1xf32>
    %cst_238 = arith.constant 3.200000e+01 : f32
    %282 = vector.broadcast %cst_238 : f32 to vector<8x1xf32>
    %283 = arith.divf %281, %282 : vector<8x1xf32>
    %cst_239 = arith.constant 9.99999974E-6 : f32
    %284 = vector.broadcast %cst_239 : f32 to vector<8x1xf32>
    %285 = arith.addf %283, %284 : vector<8x1xf32>
    %286 = math.rsqrt %285 : vector<8x1xf32>
    %287 = vector.broadcast %286 : vector<8x1xf32> to vector<8x32xf32>
    %288 = arith.mulf %278, %287 : vector<8x32xf32>
    %289 = vector.broadcast %270 : vector<1x32xf32> to vector<8x32xf32>
    %290 = arith.mulf %288, %289 : vector<8x32xf32>
    %291 = vector.broadcast %272 : vector<1x32xf32> to vector<8x32xf32>
    %292 = arith.addf %290, %291 : vector<8x32xf32>
    %c0_240 = arith.constant 0 : index
    %c0_241 = arith.constant 0 : index
    %293 = vector.load %arg22[%c0_240, %c0_241] : memref<8x32xf32, #tpu.memory_space<vmem>>, vector<8x32xf32>
    tpu.vector_store %arg22[%c0_240, %c0_241], %292 {strides = array<i32>} : memref<8x32xf32, #tpu.memory_space<vmem>>, vector<8x32xf32>,
    %c0_242 = arith.constant 0 : index
    %c0_243 = arith.constant 0 : index
    %294 = vector.load %arg22[%c0_242, %c0_243] : memref<8x32xf32, #tpu.memory_space<vmem>>, vector<8x32xf32>
    %c0_244 = arith.constant 0 : index
    %c0_245 = arith.constant 0 : index
    %c0_246 = arith.constant 0 : index
    %295 = vector.load %arg15[%c0_244, %c0_245, %c0_246] : memref<1x32x128xf32, #tpu.memory_space<vmem>>, vector<1x32x128xf32>
    %296 = vector.shape_cast %295 : vector<1x32x128xf32> to vector<32x128xf32>
    %cst_247 = arith.constant dense<0.000000e+00> : vector<8x128xf32>
    %297 = tpu.matmul %294, %296, %cst_247 {dimension_numbers = #tpu.dot_dimension_numbers<[1], [0], [0], [1], [0, 0, 1, 1], [], []>} : vector<8x32xf32>, vector<32x128xf32>, vector<8x128xf32> -> vector<8x128xf32>
    %c0_248 = arith.constant 0 : index
    %c0_249 = arith.constant 0 : index
    %c0_250 = arith.constant 0 : index
    %298 = vector.load %arg16[%c0_248, %c0_249, %c0_250] : memref<1x1x128xf32, #tpu.memory_space<vmem>>, vector<1x1x128xf32>
    %299 = vector.shape_cast %298 : vector<1x1x128xf32> to vector<1x128xf32>
    %300 = vector.broadcast %299 : vector<1x128xf32> to vector<8x128xf32>
    %301 = arith.addf %297, %300 : vector<8x128xf32>
    %cst_251 = arith.constant 0.000000e+00 : f32
    %302 = vector.broadcast %cst_251 : f32 to vector<8x128xf32>
    %303 = arith.maximumf %301, %302 : vector<8x128xf32>
    %c0_252 = arith.constant 0 : index
    %c0_253 = arith.constant 0 : index
    %c0_254 = arith.constant 0 : index
    %304 = vector.load %arg17[%c0_252, %c0_253, %c0_254] : memref<1x128x32xf32, #tpu.memory_space<vmem>>, vector<1x128x32xf32>
    %305 = vector.shape_cast %304 : vector<1x128x32xf32> to vector<128x32xf32>
    %cst_255 = arith.constant dense<0.000000e+00> : vector<8x32xf32>
    %306 = tpu.matmul %303, %305, %cst_255 {dimension_numbers = #tpu.dot_dimension_numbers<[1], [0], [0], [1], [0, 0, 1, 1], [], []>} : vector<8x128xf32>, vector<128x32xf32>, vector<8x32xf32> -> vector<8x32xf32>
    %c0_256 = arith.constant 0 : index
    %c0_257 = arith.constant 0 : index
    %307 = vector.load %arg23[%c0_256, %c0_257] : memref<8x32xf32, #tpu.memory_space<vmem>>, vector<8x32xf32>
    tpu.vector_store %arg23[%c0_256, %c0_257], %306 {strides = array<i32>} : memref<8x32xf32, #tpu.memory_space<vmem>>, vector<8x32xf32>,
    %c0_258 = arith.constant 0 : index
    %c0_259 = arith.constant 0 : index
    %308 = vector.load %arg23[%c0_258, %c0_259] : memref<8x32xf32, #tpu.memory_space<vmem>>, vector<8x32xf32>
    %c0_260 = arith.constant 0 : index
    %c0_261 = arith.constant 0 : index
    %309 = vector.load %arg18[%c0_260, %c0_261] : memref<1x32xf32, #tpu.memory_space<vmem>>, vector<1x32xf32>
    %310 = vector.broadcast %309 : vector<1x32xf32> to vector<8x32xf32>
    %311 = arith.addf %308, %310 : vector<8x32xf32>
    %c0_262 = arith.constant 0 : index
    %c0_263 = arith.constant 0 : index
    %312 = vector.load %arg22[%c0_262, %c0_263] : memref<8x32xf32, #tpu.memory_space<vmem>>, vector<8x32xf32>
    %313 = arith.addf %312, %311 : vector<8x32xf32>
    %314 = vector.extract_strided_slice %2 {offsets = [2, 0, 0], sizes = [1, 1, 32], strides = [1, 1, 1]} : vector<3x1x32xf32> to vector<1x1x32xf32>
    %315 = vector.shape_cast %314 : vector<1x1x32xf32> to vector<1x32xf32>
    %316 = vector.extract_strided_slice %3 {offsets = [2, 0, 0], sizes = [1, 1, 32], strides = [1, 1, 1]} : vector<3x1x32xf32> to vector<1x1x32xf32>
    %317 = vector.shape_cast %316 : vector<1x1x32xf32> to vector<1x32xf32>
    %cst_264 = arith.constant dense<0.000000e+00> : vector<8xf32>
    %318 = vector.multi_reduction <add>, %313, %cst_264 [1] : vector<8x32xf32> to vector<8xf32>
    %319 = vector.shape_cast %318 : vector<8xf32> to vector<8x1xf32>
    %cst_265 = arith.constant 3.200000e+01 : f32
    %320 = vector.broadcast %cst_265 : f32 to vector<8x1xf32>
    %321 = arith.divf %319, %320 : vector<8x1xf32>
    %322 = vector.broadcast %321 : vector<8x1xf32> to vector<8x32xf32>
    %323 = arith.subf %313, %322 : vector<8x32xf32>
    %324 = arith.mulf %323, %323 : vector<8x32xf32>
    %cst_266 = arith.constant dense<0.000000e+00> : vector<8xf32>
    %325 = vector.multi_reduction <add>, %324, %cst_266 [1] : vector<8x32xf32> to vector<8xf32>
    %326 = vector.shape_cast %325 : vector<8xf32> to vector<8x1xf32>
    %cst_267 = arith.constant 3.200000e+01 : f32
    %327 = vector.broadcast %cst_267 : f32 to vector<8x1xf32>
    %328 = arith.divf %326, %327 : vector<8x1xf32>
    %cst_268 = arith.constant 9.99999974E-6 : f32
    %329 = vector.broadcast %cst_268 : f32 to vector<8x1xf32>
    %330 = arith.addf %328, %329 : vector<8x1xf32>
    %331 = math.rsqrt %330 : vector<8x1xf32>
    %332 = vector.broadcast %331 : vector<8x1xf32> to vector<8x32xf32>
    %333 = arith.mulf %323, %332 : vector<8x32xf32>
    %334 = vector.broadcast %315 : vector<1x32xf32> to vector<8x32xf32>
    %335 = arith.mulf %333, %334 : vector<8x32xf32>
    %336 = vector.broadcast %317 : vector<1x32xf32> to vector<8x32xf32>
    %337 = arith.addf %335, %336 : vector<8x32xf32>
    %c0_269 = arith.constant 0 : index
    %c0_270 = arith.constant 0 : index
    %c0_271 = arith.constant 0 : index
    %338 = vector.load %arg21[%c0_269, %c0_270, %c0_271] : memref<1x8x32xf32, #tpu.memory_space<vmem>>, vector<1x8x32xf32>
    %339 = vector.shape_cast %338 : vector<1x8x32xf32> to vector<8x32xf32>
    %340 = vector.shape_cast %337 : vector<8x32xf32> to vector<1x8x32xf32>
    tpu.vector_store %arg21[%c0_269, %c0_270, %c0_271], %340 {strides = array<i32>} : memref<1x8x32xf32, #tpu.memory_space<vmem>>, vector<1x8x32xf32>,
    return
  }
  func.func @transform_0(%arg0: i32, %arg1: i32) -> (i32, i32, i32) {
    %c0_i32 = arith.constant 0 : i32
    %c0_i32_0 = arith.constant 0 : i32
    return %arg0, %arg1, %c0_i32 : i32, i32, i32
  }
  func.func @transform_1(%arg0: i32, %arg1: i32) -> (i32, i32, i32, i32) {
    %c0_i32 = arith.constant 0 : i32
    %c0_i32_0 = arith.constant 0 : i32
    %c0_i32_1 = arith.constant 0 : i32
    %c0_i32_2 = arith.constant 0 : i32
    return %arg0, %c0_i32, %c0_i32_0, %c0_i32_1 : i32, i32, i32, i32
  }
  func.func @transform_2(%arg0: i32, %arg1: i32) -> (i32, i32, i32, i32) {
    %c0_i32 = arith.constant 0 : i32
    %c0_i32_0 = arith.constant 0 : i32
    %c0_i32_1 = arith.constant 0 : i32
    %c0_i32_2 = arith.constant 0 : i32
    return %arg0, %c0_i32, %c0_i32_0, %c0_i32_1 : i32, i32, i32, i32
  }
  func.func @transform_3(%arg0: i32, %arg1: i32) -> (i32, i32, i32, i32) {
    %c0_i32 = arith.constant 0 : i32
    %c0_i32_0 = arith.constant 0 : i32
    %c0_i32_1 = arith.constant 0 : i32
    %c0_i32_2 = arith.constant 0 : i32
    return %arg0, %c0_i32, %c0_i32_0, %c0_i32_1 : i32, i32, i32, i32
  }
  func.func @transform_4(%arg0: i32, %arg1: i32) -> (i32, i32, i32, i32) {
    %c0_i32 = arith.constant 0 : i32
    %c0_i32_0 = arith.constant 0 : i32
    %c0_i32_1 = arith.constant 0 : i32
    %c0_i32_2 = arith.constant 0 : i32
    return %arg0, %c0_i32, %c0_i32_0, %c0_i32_1 : i32, i32, i32, i32
  }
  func.func @transform_5(%arg0: i32, %arg1: i32) -> (i32, i32, i32) {
    %c0_i32 = arith.constant 0 : i32
    %c0_i32_0 = arith.constant 0 : i32
    %c0_i32_1 = arith.constant 0 : i32
    %c0_i32_2 = arith.constant 0 : i32
    return %c0_i32, %c0_i32_0, %c0_i32_1 : i32, i32, i32
  }
  func.func @transform_6(%arg0: i32, %arg1: i32) -> (i32, i32, i32) {
    %c0_i32 = arith.constant 0 : i32
    %c0_i32_0 = arith.constant 0 : i32
    %c0_i32_1 = arith.constant 0 : i32
    %c0_i32_2 = arith.constant 0 : i32
    return %c0_i32, %c0_i32_0, %c0_i32_1 : i32, i32, i32
  }
  func.func @transform_7(%arg0: i32, %arg1: i32) -> (i32, i32, i32) {
    %c0_i32 = arith.constant 0 : i32
    %c0_i32_0 = arith.constant 0 : i32
    %c0_i32_1 = arith.constant 0 : i32
    %c0_i32_2 = arith.constant 0 : i32
    return %c0_i32, %c0_i32_0, %c0_i32_1 : i32, i32, i32
  }
  func.func @transform_8(%arg0: i32, %arg1: i32) -> (i32, i32) {
    %c0_i32 = arith.constant 0 : i32
    %c0_i32_0 = arith.constant 0 : i32
    %c0_i32_1 = arith.constant 0 : i32
    return %c0_i32, %c0_i32_0 : i32, i32
  }
  func.func @transform_9(%arg0: i32, %arg1: i32) -> (i32, i32, i32) {
    %c0_i32 = arith.constant 0 : i32
    %c0_i32_0 = arith.constant 0 : i32
    %c0_i32_1 = arith.constant 0 : i32
    %c0_i32_2 = arith.constant 0 : i32
    return %c0_i32, %c0_i32_0, %c0_i32_1 : i32, i32, i32
  }
  func.func @transform_10(%arg0: i32, %arg1: i32) -> (i32, i32, i32) {
    %c0_i32 = arith.constant 0 : i32
    %c0_i32_0 = arith.constant 0 : i32
    %c0_i32_1 = arith.constant 0 : i32
    %c0_i32_2 = arith.constant 0 : i32
    return %c0_i32, %c0_i32_0, %c0_i32_1 : i32, i32, i32
  }
  func.func @transform_11(%arg0: i32, %arg1: i32) -> (i32, i32, i32) {
    %c0_i32 = arith.constant 0 : i32
    %c0_i32_0 = arith.constant 0 : i32
    %c0_i32_1 = arith.constant 0 : i32
    %c0_i32_2 = arith.constant 0 : i32
    return %c0_i32, %c0_i32_0, %c0_i32_1 : i32, i32, i32
  }
  func.func @transform_12(%arg0: i32, %arg1: i32) -> (i32, i32) {
    %c0_i32 = arith.constant 0 : i32
    %c0_i32_0 = arith.constant 0 : i32
    %c0_i32_1 = arith.constant 0 : i32
    return %c0_i32, %c0_i32_0 : i32, i32
  }
  func.func @transform_13(%arg0: i32, %arg1: i32) -> (i32, i32, i32) {
    %c0_i32 = arith.constant 0 : i32
    %c0_i32_0 = arith.constant 0 : i32
    %c0_i32_1 = arith.constant 0 : i32
    %c0_i32_2 = arith.constant 0 : i32
    return %c0_i32, %c0_i32_0, %c0_i32_1 : i32, i32, i32
  }
  func.func @transform_14(%arg0: i32, %arg1: i32) -> (i32, i32, i32) {
    %c0_i32 = arith.constant 0 : i32
    %c0_i32_0 = arith.constant 0 : i32
    %c0_i32_1 = arith.constant 0 : i32
    %c0_i32_2 = arith.constant 0 : i32
    return %c0_i32, %c0_i32_0, %c0_i32_1 : i32, i32, i32
  }
  func.func @transform_15(%arg0: i32, %arg1: i32) -> (i32, i32, i32) {
    %c0_i32 = arith.constant 0 : i32
    %c0_i32_0 = arith.constant 0 : i32
    %c0_i32_1 = arith.constant 0 : i32
    %c0_i32_2 = arith.constant 0 : i32
    return %c0_i32, %c0_i32_0, %c0_i32_1 : i32, i32, i32
  }
  func.func @transform_16(%arg0: i32, %arg1: i32) -> (i32, i32) {
    %c0_i32 = arith.constant 0 : i32
    %c0_i32_0 = arith.constant 0 : i32
    %c0_i32_1 = arith.constant 0 : i32
    return %c0_i32, %c0_i32_0 : i32, i32
  }
  func.func @transform_17(%arg0: i32, %arg1: i32) -> (i32, i32, i32) {
    %c0_i32 = arith.constant 0 : i32
    %c0_i32_0 = arith.constant 0 : i32
    %c0_i32_1 = arith.constant 0 : i32
    %c0_i32_2 = arith.constant 0 : i32
    return %c0_i32, %c0_i32_0, %c0_i32_1 : i32, i32, i32
  }
  func.func @transform_18(%arg0: i32, %arg1: i32) -> (i32, i32, i32) {
    %c0_i32 = arith.constant 0 : i32
    %c0_i32_0 = arith.constant 0 : i32
    %c0_i32_1 = arith.constant 0 : i32
    %c0_i32_2 = arith.constant 0 : i32
    return %c0_i32, %c0_i32_0, %c0_i32_1 : i32, i32, i32
  }
  func.func @transform_19(%arg0: i32, %arg1: i32) -> (i32, i32, i32) {
    %c0_i32 = arith.constant 0 : i32
    %c0_i32_0 = arith.constant 0 : i32
    return %arg0, %arg1, %c0_i32 : i32, i32, i32
  }
}

</mosaic_0001>

<bundles_post_ra>
// kernel: tpu_custom_call.1
= control target key start
LH: loop header
LB: loop body
LE: loop exit
PB: predicated region body
PF: predicated region fallthrough
CT: control target
= control target key end

     0   :  { %s5280_s0 = inlined_call_operand.vmem [shape: f32[2,8,32], index: 0, kind: input, shape index: {}]   ;;  %s5281_s1 = inlined_call_operand.vmem [shape: f32[2,4,8,8], index: 1, kind: input, shape index: {}]   ;;  %s5282_s2 = inlined_call_operand.vmem [shape: f32[2,4,8,8], index: 2, kind: input, shape index: {}]   ;;  %s5283_s3 = inlined_call_operand.vmem [shape: f32[2,4,16,8], index: 3, kind: input, shape index: {}]   ;;  %s5284_s4 = inlined_call_operand.vmem [shape: f32[2,4,16,8], index: 4, kind: input, shape index: {}]   ;;  %s5285_s5 = inlined_call_operand.vmem [shape: f32[4,32,8], index: 5, kind: input, shape index: {}]   ;;  %s5286_s6 = inlined_call_operand.vmem [shape: f32[4,1,8], index: 6, kind: input, shape index: {}]   ;;  %s5287_s7 = inlined_call_operand.vmem [shape: f32[4,8,32], index: 7, kind: input, shape index: {}]   ;;  %s5288_s8 = inlined_call_operand.vmem [shape: f32[1,32], index: 8, kind: input, shape index: {}]   ;;  %s5289_s9 = inlined_call_operand.vmem [shape: f32[4,32,8], index: 9, kind: input, shape index: {}]   ;;  %s5290_s10 = inlined_call_operand.vmem [shape: f32[4,1,8], index: 10, kind: input, shape index: {}]   ;;  %s5291_s11 = inlined_call_operand.vmem [shape: f32[4,8,32], index: 11, kind: input, shape index: {}]   ;;  %s5292_s12 = inlined_call_operand.vmem [shape: f32[1,32], index: 12, kind: input, shape index: {}]   ;;  %s5293_s13 = inlined_call_operand.vmem [shape: f32[1,32,128], index: 13, kind: input, shape index: {}]   ;;  %s5294_s14 = inlined_call_operand.vmem [shape: f32[1,1,128], index: 14, kind: input, shape index: {}]   ;;  %s5295_s15 = inlined_call_operand.vmem [shape: f32[1,128,32], index: 15, kind: input, shape index: {}]   ;;  %s5296_s16 = inlined_call_operand.vmem [shape: f32[1,32], index: 16, kind: input, shape index: {}]   ;;  %s5297_s17 = inlined_call_operand.vmem [shape: f32[3,1,32], index: 17, kind: input, shape index: {}]   ;;  %s5298_s18 = inlined_call_operand.vmem [shape: f32[3,1,32], index: 18, kind: input, shape index: {}]   ;;  %s5299_s19 = inlined_call_operand.hbm [shape: f32[2,8,32], index: 19, kind: output, shape index: {}]  }
   0x1   :  { %5305 = sst [smem:[#allocation13_spill]] %s5280_s0 }
   0x2   :  { %5306 = sst [smem:[#allocation14_spill]] %s5281_s1 }
   0x3   :  { %5307 = sst [smem:[#allocation15_spill]] %s5282_s2 }
   0x4   :  { %5308 = sst [smem:[#allocation16_spill]] %s5283_s3 }
   0x5   :  { %5309 = sst [smem:[#allocation17_spill]] %s5284_s4 }
   0x6   :  { %24 = vsyncpa [#allocation5], 0 }
   0x7   :  { %26 = vsyncpa [#allocation5 + $0x1], 0  ;;  %s4664_s0 = smov 0   ;;  %s4666_s30 = smov 0  }
   0x8   :  { %s4668_s20 = smov 0   ;;  %s4670_s21 = smov 0  }
   0x9   :  { %s4672_s1 = smov 0   ;;  %s4674_s22 = smov 0  }
   0xa LB: > { %5310 = sst [smem:[#allocation7_spill]] %s4538_s0  ;;  %s3750_s2 = sadd.s32 4294967295, %s4558_s22   ;;  %s4558_s22 = sphi %s4674_s22, %s32_s22   ;;  %s4554_s1 = sphi %s4672_s1, %s5330_s1   ;;  %s4550_s21 = sphi %s4670_s21, %s5329_s21   ;;  %s4546_s20 = sphi %s4668_s20, %s5333_s20   ;;  %s4542_s30 = sphi %s4666_s30, %s5332_s30   ;;  %s4538_s0 = sphi %s4664_s0, %s5331_s0  }
   0xb   : > { %5311 = sst [smem:[#allocation8_spill]] %s4546_s20  ;;  %s3751_s23 = sadd.s32 4294967294, %s4558_s22  }
   0xc   : > { %5312 = sst [smem:[#allocation9_spill]] %s4554_s1  ;;  %s44_s24 = sadd.s32 1, %s4554_s1 }
   0xd   : > { %s479_s25 = sadd.s32 1, %s4546_s20  ;;  %p46_p0 = scmp.ge.s32.totalorder %s44_s24, 2 }
   0xe   : > { %p489_p1 = scmp.ne.s32.totalorder %s4546_s20, %s4542_s30  ;;  %p490_p2 = scmp.eq.s32.totalorder %s3750_s2, 1 }
   0xf   : > { %p495_p3 = scmp.ne.s32.totalorder %s4542_s30, %s4538_s0  ;;  %s5335_s24 = smov (%p46_p0, %s44_s24), 0 }
  0x10   : > { %5313 = sst [smem:[#allocation10_spill]] %s5335_s24  ;;  %p4704_p4 = por %p490_p2, %p489_p1 }
  0x11   : > { %p496_p5 = scmp.eq.s32.totalorder %s3751_s23, 1  ;;  %s474_s26 = ssub.s32 %s4554_s1, %s5335_s24 }
  0x12   : > { %p3754_p6 = scmp.ge.s32.totalorder %s4558_s22, 1  ;;  %p477_p7 = scmp.eq.s32.totalorder %s474_s26, 0 }
  0x13   : > { %p4711_p8 = por %p496_p5, %p495_p3  ;;  %p598_p9 = scmp.lt.s32.totalorder %s4558_s22, 3 }
  0x14   : > { %s4717_s28 = scalar_select %p477_p7, %s4546_s20, %s479_s25  }
  0x15   : > { %s5315_s27 = scalar_select %p4711_p8, 1, 0 }
  0x16   : > { %5317 = sst [smem:[#allocation12_spill]] %s4717_s28  ;;  %p599_p10 = pnand %p3754_p6, %p598_p9 }
  0x17   : > { %5316 = sst [smem:[#allocation11_spill]] %s5315_s27  ;;  %v710_v0 = vld [vmem:[%s5285_s5] sm:$0xff] (!%p599_p10)  ;;  %v711_v1 = vld [vmem:[%s5285_s5 + $0x8] sm:$0xff] (!%p599_p10)  ;;  %v712_v2 = vld [vmem:[%s5285_s5 + $0x10] sm:$0xff] (!%p599_p10)  ;;  %v4560_v3 = vmov (!%p599_p10), 0.0|0.0   ;;  %vm4561_vm0 = vmmov (!%p599_p10), 0  }
  0x18   : > { %602 = sbr.rel (%p599_p10) target bundleno = 8501 (0x2135), region = 96  ;;  %4278 = vmatprep.subr.bf16.mxu0 (!%p599_p10), %v4560_v3  ;;  %v4279_v4 = vpack.c.bf16 (!%p599_p10), %v711_v1, %v710_v0  ;;  %v713_v5 = vld [vmem:[%s5285_s5 + $0x18] sm:$0xff] (!%p599_p10)  ;;  %v4562_v6 = vmov (!%p599_p10), 0.0   ;;  %p676_p11 = scmp.lt.s32.totalorder (!%p599_p10), %s4550_s21, 1  ;;  %vm721_vm1 = vcmask (!%p599_p10), 261120   ;;  %vm796_vm2 = vcmask (!%p599_p10), 64512  }
  0x19   : > { %4016 = vmatprep.mubr.msk.f32.mxu0 (!%p599_p10), %vm4561_vm0, %v4562_v6  ;;  %4024 = vmatprep.subr.mxu1 (!%p599_p10), %v4562_v6  ;;  %v4282_v7 = vpack.c.bf16 (!%p599_p10), %v713_v5, %v712_v2  ;;  %s5318_s2 = sld [smem:[#allocation13_spill]] (!%p599_p10)  ;;  %s5319_s20 = sld [smem:[#allocation14_spill]] (!%p599_p10)  ;;  %v3765_v10 = vld [vmem:[%s5286_s6] ss:$0 sm:$0xff] (!%p599_p10)  ;;  %v3772_v28 = vld [vmem:[%s5285_s5 + $0x28] sm:$0xff] (!%p599_p10)  ;;  %v3773_v30 = vld [vmem:[%s5285_s5 + $0x30] sm:$0xff] (!%p599_p10) }
  0x1a   : > { %4026 = vmatprep.mubr.msk.f32.mxu1 (!%p599_p10), %vm4561_vm0, %v4562_v6  ;;  %4280 = vmatpush3.bf16.msra.mxu0 (!%p599_p10), %v4279_v4  ;;  %s5320_s29 = sld [smem:[#allocation15_spill]] (!%p599_p10)  ;;  %v958_v23 = vld [vmem:[%s5287_s7] sm:$0xff] (!%p599_p10)  ;;  %v3774_v31 = vld [vmem:[%s5285_s5 + $0x38] sm:$0xff] (!%p599_p10)  ;;  %v3783_v51 = vld [vmem:[%s5287_s7 + $0x8] sm:$0xff] (!%p599_p10)  ;;  %vm2213_vm4 = vcmask (!%p599_p10), 130048   ;;  %s5324_s4 = sld [smem:[#allocation17_spill]] (!%p599_p10) }
  0x1b   : > { %4281 = vmatprep.subr.bf16.mxu0 (!%p599_p10), %v4560_v3  ;;  %v3771_v27 = vld [vmem:[%s5285_s5 + $0x20] sm:$0xff] (!%p599_p10)  ;;  %v4288_v34 = vpack.c.bf16 (!%p599_p10), %v3774_v31, %v3773_v30  ;;  %v3786_v54 = vld [vmem:[%s5285_s5 + $0x48] sm:$0xff] (!%p599_p10)  ;;  %v3787_v58 = vld [vmem:[%s5285_s5 + $0x50] sm:$0xff] (!%p599_p10) }
  0x1c   : > { %v4285_v29 = vpack.c.bf16 (!%p599_p10), %v3772_v28, %v3771_v27  ;;  %v3776_v38 = vld [vmem:[%s5286_s6 + $0x1] ss:$0 sm:$0xff] (!%p599_p10)  ;;  %v3788_v59 = vld [vmem:[%s5285_s5 + $0x58] sm:$0xff] (!%p599_p10)  ;;  %v3790_v0 = vld [vmem:[%s5286_s6 + $0x2] ss:$0 sm:$0xff] (!%p599_p10) }
  0x1d   : > { %v3785_v53 = vld [vmem:[%s5285_s5 + $0x40] sm:$0xff] (!%p599_p10)  ;;  %v4294_v60 = vpack.c.bf16 (!%p599_p10), %v3788_v59, %v3787_v58  ;;  %v3801_v27 = vld [vmem:[%s5285_s5 + $0x70] sm:$0xff] (!%p599_p10)  ;;  %v3802_v28 = vld [vmem:[%s5285_s5 + $0x78] sm:$0xff] (!%p599_p10) }
  0x1e   : > { %4283 = vmatpush3.bf16.msra.mxu0 (!%p599_p10), %v4282_v7  ;;  %v4291_v56 = vpack.c.bf16 (!%p599_p10), %v3786_v54, %v3785_v53  ;;  %vm4946_vm3 = vmpackc.low (!%p599_p10), %vm796_vm2, %vm796_vm2 }
  0x1f   : > { %s4739_s0 = scalar_select %p676_p11, %s4550_s21, 1  ;;  %4019 = vmatprep.subr.mxu0 %v4562_v6 }
  0x21   : > { %s3756_s1 = sshll.u32 %s4739_s0, 3  ;;  %s3886_s26 = sshll.u32 %s4739_s0, 5 }
  0x22   : > { %s682_s23 = scalar_lea.vmem %s5318_s2, %s3756_s1  ;;  %s4755_s27 = scalar_lea.vmem %s5319_s20, %s3886_s26 }
  0x23   : > { %v4746_v8 = vld [vmem:[%s682_s23] sm:$0xff]  ;;  %s4773_s2 = scalar_lea.vmem %s5320_s29, %s3886_s26  ;;  %v3778_v35 = vld [vmem:[%s4755_s27 + $0x8] sm:$0xff]  ;;  %v3792_v61 = vld [vmem:[%s4755_s27 + $0x10] sm:$0xff]  ;;  %s5321_s29 = sld [smem:[#allocation16_spill]] }
  0x24   : > { %4017 = vmatmul.mubr.msk.f32.vlgmr.msra.gmra.mrb[0].mxu0 %vm721_vm1, %v4746_v8  ;;  %v795_v9 = vld [vmem:[%s4755_s27] sm:$0xff]  ;;  %v3781_v50 = vld [vmem:[%s4773_s2 + $0x8] sm:$0xff]  ;;  %v3806_v30 = vld [vmem:[%s4755_s27 + $0x18] sm:$0xff]  ;;  %s673_s20 = sand.u32 1, %s4542_s30   ;;  %s3883_s1 = sshll.u32 %s4550_s21, 7 }
  0x25   : > { %4021 = vmatprep.mubr.msk.f32.mxu0 %vm4561_vm0, %v4562_v6  ;;  %v884_v22 = vld [vmem:[%s4773_s2] sm:$0xff]  ;;  %s3755_s28 = sshll.u32 %s673_s20, 3  ;;  %s4563_s21 = smov [#allocation4]  }
  0x26   : > { %4025 = vmatpush3.msra.mxu1 %v884_v22  ;;  %v3799_v22 = vld [vmem:[%s5285_s5 + $0x60] sm:$0xff] }
  0x27   : > { %4020 = vmatpush3.xpose.msk.msra.mxu0 %vm796_vm2, %v795_v9  ;;  %4055 = vmatprep.subr.mxu1 %v4562_v6 }
  0x28   : > { %4029 = vmatprep.subr.mxu0 %v4562_v6 }
  0xf7   : > { %v791_v11 = vpop.f32.mrb[0].mxu0 }
  0xf8   : > { %v792_v12 = vadd.f32 %v3765_v10, %v791_v11  ;;  %v4018_v13 = vpop.f32.mrb[1].mxu0 }
  0xfa   : > { %4022 = vmatmul.mubr.msk.f32.vlgmr.msra.gmra.mrb[2].mxu0 %vm796_vm2, %v792_v12 }
  0xfb   : > { %4031 = vmatprep.mubr.msk.f32.mxu0 %vm4561_vm0, %v4562_v6  ;;  %4030 = vmatpush3.msra.mxu0 %v958_v23  ;;  %v3800_v23 = vld [vmem:[%s5285_s5 + $0x68] sm:$0xff] }
  0xfc   : > { %4284 = vmatprep.subr.bf16.mxu0 %v4560_v3 }
 0x1cd   : > { %v869_v14 = vpop.f32.mrb[2].mxu0 }
 0x1ce   : > { %v4023_v15 = vpop.f32.mrb[3].mxu0  ;;  %v873_v16 = vsel %vm796_vm2, %v869_v14, -inf }
 0x1cf   : > { %874 = vmax.xlane.f32.xlu0 %v873_v16 }
 0x25c   : > { %v875_v17 = vpop.xlane.xlu0 %874 }
 0x25d   : > { %v876_v18 = vsub.f32 %v869_v14, %v875_v17 }
 0x25f   : > { %v877_v19 = vmul.f32 1.442695, %v876_v18 }
 0x261   : > { %4442 = vpow2.f32 %v877_v19  ;;  %v3795_v19 = vld [vmem:[%s4773_s2 + $0x10] sm:$0xff] }
 0x26b   : > { %v4443_v20 = vpop.eup %4442 }
 0x26c   : > { %v879_v21 = vsel %vm796_vm2, %v4443_v20, 0.0 }
 0x26d   : > { %880 = vadd.xlane.f32.xlu0 %v879_v21 }
 0x2fa   : > { %v881_v24 = vpop.xlane.xlu0 %880 }
 0x2fb   : > { %4444 = vrcp.f32 %v881_v24 }
 0x305   : > { %v4445_v25 = vpop.eup %4444 }
 0x306   : > { %v883_v26 = vmul.f32 %v4445_v25, %v4443_v20  ;;  %v3797_v20 = vld [vmem:[%s5287_s7 + $0x10] sm:$0xff]  ;;  %v4297_v25 = vpack.c.bf16 %v3800_v23, %v3799_v22  ;;  %v3814_v22 = vld [vmem:[%s5297_s17] ss:$0 sm:$0xff] }
 0x308   : > { %4027 = vmatmul.mubr.msk.f32.vlgmr.msra.gmra.mrb[0].mxu1 %vm796_vm2, %v883_v26 }
 0x309   : > { %4057 = vmatprep.mubr.msk.f32.mxu1 %vm4561_vm0, %v4562_v6  ;;  %4056 = vmatpush3.msra.mxu1 %v3783_v51 }
 0x30a   : > { %4071 = vmatprep.subr.mxu1 %v4562_v6 }
 0x3db   : > { %v954_v32 = vpop.f32.mrb[0].mxu1 }
 0x3dc   : > { %v4028_v33 = vpop.f32.mrb[1].mxu1  ;;  %4032 = vmatmul.mubr.msk.f32.vlgmr.msra.gmra.mrb[4].mxu0 %vm796_vm2, %v954_v32 }
 0x3dd   : > { %4286 = vmatpush3.bf16.msra.mxu0 %v4285_v29  ;;  %4042 = vmatprep.mubr.msk.f32.mxu0 %vm4561_vm0, %v4562_v6  ;;  %v4300_v29 = vpack.c.bf16 %v3802_v28, %v3801_v27  ;;  %v3804_v33 = vld [vmem:[%s5286_s6 + $0x3] ss:$0 sm:$0xff]  ;;  %v3816_v28 = vld [vmem:[%s5290_s10] ss:$0 sm:$0xff] }
 0x3de   : > { %4287 = vmatprep.subr.bf16.mxu0 %v4560_v3 }
 0x3e1   : > { %4289 = vmatpush3.bf16.msra.mxu0 %v4288_v34 }
 0x3e2   : > { %4045 = vmatprep.subr.mxu0 %v4562_v6 }
 0x3e4   : > { %4043 = vmatmul.mubr.msk.f32.vlgmr.msra.gmra.mrb[6].mxu0 %vm721_vm1, %v4746_v8 }
 0x3e5   : > { %4047 = vmatprep.mubr.msk.f32.mxu0 %vm4561_vm0, %v4562_v6 }
 0x3ea   : > { %4046 = vmatpush3.xpose.msk.msra.mxu0 %vm796_vm2, %v3778_v35 }
 0x3eb   : > { %4050 = vmatprep.subr.mxu0 %v4562_v6 }
 0x4af   : > { %v1028_v36 = vpop.f32.mrb[4].mxu0 }
 0x4b0   : > { %1032 = vst.msk [vmem:[#allocation3] sm:$0xff] %vm721_vm1, %v1028_v36  ;;  %v4033_v37 = vpop.f32.mrb[5].mxu0 }
 0x4b7   : > { %v1112_v39 = vpop.f32.mrb[6].mxu0  ;;  %v1355_v7 = vld [vmem:[#allocation3] sm:$0xff] }
 0x4b8   : > { %v1113_v40 = vadd.f32 %v3776_v38, %v1112_v39  ;;  %v4044_v41 = vpop.f32.mrb[7].mxu0 }
 0x4ba   : > { %4048 = vmatmul.mubr.msk.f32.vlgmr.msra.gmra.mrb[8].mxu0 %vm796_vm2, %v1113_v40 }
 0x4bb   : > { %4052 = vmatprep.mubr.msk.f32.mxu0 %vm4561_vm0, %v4562_v6  ;;  %4051 = vmatpush3.msra.mxu0 %v3781_v50  ;;  %v3811_v50 = vld [vmem:[%s5287_s7 + $0x18] sm:$0xff] }
 0x4bc   : > { %4290 = vmatprep.subr.bf16.mxu0 %v4560_v3 }
 0x58d   : > { %v1190_v42 = vpop.f32.mrb[8].mxu0 }
 0x58e   : > { %v4049_v43 = vpop.f32.mrb[9].mxu0  ;;  %v1194_v44 = vsel %vm796_vm2, %v1190_v42, -inf }
 0x58f   : > { %1195 = vmax.xlane.f32.xlu1 %v1194_v44 }
 0x61c   : > { %v1196_v45 = vpop.xlane.xlu1 %1195 }
 0x61d   : > { %v1197_v46 = vsub.f32 %v1190_v42, %v1196_v45 }
 0x61f   : > { %v1198_v47 = vmul.f32 1.442695, %v1197_v46 }
 0x621   : > { %4446 = vpow2.f32 %v1198_v47 }
 0x62b   : > { %v4447_v48 = vpop.eup %4446 }
 0x62c   : > { %v1200_v49 = vsel %vm796_vm2, %v4447_v48, 0.0 }
 0x62d   : > { %1201 = vadd.xlane.f32.xlu1 %v1200_v49  ;;  %v3809_v49 = vld [vmem:[%s4773_s2 + $0x18] sm:$0xff]  ;;  %s3888_s2 = sshll.u32 %s4739_s0, 6  ;;  %s675_s0 = scalar_lea.vmem [#allocation4], %s3755_s28 }
 0x62e   : > { %s4939_s23 = scalar_lea.vmem %s5321_s29, %s3888_s2  ;;  %s4979_s25 = scalar_lea.vmem %s5324_s4, %s3888_s2 }
 0x62f   : > { %s3631_s2 = sshll.u32 %s675_s0, 4  ;;  %s5232_s4 = scalar_lea.hbm %s5299_s19, %s3883_s1  ;;  %s5234_s2 = int_to_ptr.vmem [resolvable:$true] %s3631_s2 }
 0x630   : > { %s3617_s29 = scalar_lea.sflag [#allocation5], %s673_s20  ;;  %s4484_s28 = sshll.u32 %s4563_s21, 4  ;;  %s4485_s28 = int_to_ptr.vmem [resolvable:$false] %s4484_s28 }
 0x631   : > { %s4486_s26 = scalar_lea.vmem %s4485_s28, 256  ;;  %p4487_p1 = scmp.lt.s32.totalorder %s5234_s2, %s4485_s28 }
 0x6ba   : > { %v1202_v52 = vpop.xlane.xlu1 %1201 }
 0x6bb   : > { %4448 = vrcp.f32 %v1202_v52 }
 0x6c5   : > { %v4449_v55 = vpop.eup %4448 }
 0x6c6   : > { %v1204_v57 = vmul.f32 %v4449_v55, %v4447_v48 }
 0x6c8   : > { %4053 = vmatmul.mubr.msk.f32.vlgmr.msra.gmra.mrb[10].mxu0 %vm796_vm2, %v1204_v57 }
 0x6c9   : > { %4292 = vmatpush3.bf16.msra.mxu0 %v4291_v56  ;;  %4068 = vmatprep.mubr.msk.f32.mxu0 %vm4561_vm0, %v4562_v6 }
 0x6ca   : > { %4293 = vmatprep.subr.bf16.mxu0 %v4560_v3 }
 0x6cd   : > { %4295 = vmatpush3.bf16.msra.mxu0 %v4294_v60  ;;  %v3813_v60 = vld [vmem:[%s5288_s8] ss:$0 sm:$0xff] }
 0x6ce   : > { %4081 = vmatprep.subr.mxu0 %v4562_v6 }
 0x6d0   : > { %4069 = vmatmul.mubr.msk.f32.vlgmr.msra.gmra.mrb[12].mxu0 %vm721_vm1, %v4746_v8 }
 0x6d1   : > { %4083 = vmatprep.mubr.msk.f32.mxu0 %vm4561_vm0, %v4562_v6  ;;  %4082 = vmatpush3.msra.mxu0 %v3797_v20 }
 0x6d2   : > { %4097 = vmatprep.subr.mxu0 %v4562_v6 }
 0x79b   : > { %v1276_v62 = vpop.f32.mrb[10].mxu0 }
 0x79c   : > { %v4054_v63 = vpop.f32.mrb[11].mxu0  ;;  %4058 = vmatmul.mubr.msk.f32.vlgmr.msra.gmra.mrb[2].mxu1 %vm796_vm2, %v1276_v62 }
 0x79d   : > { %4072 = vmatpush3.xpose.msk.msra.mxu1 %vm796_vm2, %v3792_v61  ;;  %4073 = vmatprep.mubr.msk.f32.mxu1 %vm4561_vm0, %v4562_v6 }
 0x79e   : > { %4076 = vmatprep.subr.mxu1 %v4562_v6 }
 0x7a3   : > { %v1437_v1 = vpop.f32.mrb[12].mxu0 }
 0x7a4   : > { %v1438_v2 = vadd.f32 %v3790_v0, %v1437_v1  ;;  %v4070_v4 = vpop.f32.mrb[13].mxu0 }
 0x7a6   : > { %4074 = vmatmul.mubr.msk.f32.vlgmr.msra.gmra.mrb[4].mxu1 %vm796_vm2, %v1438_v2 }
 0x7a7   : > { %4078 = vmatprep.mubr.msk.f32.mxu1 %vm4561_vm0, %v4562_v6  ;;  %4077 = vmatpush3.msra.mxu1 %v3795_v19 }
 0x7a8   : > { %4296 = vmatprep.subr.bf16.mxu1 %v4560_v3 }
 0x86f   : > { %v1351_v5 = vpop.f32.mrb[2].mxu1 }
 0x870   : > { %v1356_v9 = vadd.f32 %v1355_v7, %v1351_v5  ;;  %v4059_v10 = vpop.f32.mrb[3].mxu1 }
 0x872   : > { %1357 = vst.msk [vmem:[#allocation3] sm:$0xff] %vm721_vm1, %v1356_v9  ;;  %v2048_v9 = vld [vmem:[%s5289_s9] sm:$0xff] }
 0x879   : > { %v1515_v11 = vpop.f32.mrb[4].mxu1  ;;  %v1680_v38 = vld [vmem:[#allocation3] sm:$0xff] }
 0x87a   : > { %v4075_v12 = vpop.f32.mrb[5].mxu1  ;;  %v1519_v13 = vsel %vm796_vm2, %v1515_v11, -inf }
 0x87b   : > { %1520 = vmax.xlane.f32.xlu0 %v1519_v13  ;;  %v2051_v12 = vld [vmem:[%s5289_s9 + $0x18] sm:$0xff] }
 0x908   : > { %v1521_v14 = vpop.xlane.xlu0 %1520 }
 0x909   : > { %v1522_v15 = vsub.f32 %v1515_v11, %v1521_v14  ;;  %v2050_v11 = vld [vmem:[%s5289_s9 + $0x10] sm:$0xff]  ;;  %v2132_v14 = vld [vmem:[%s4939_s23] sm:$0xff] }
 0x90a   : > { %v4306_v13 = vpack.c.bf16 %v2051_v12, %v2050_v11  ;;  %v3836_v11 = vld [vmem:[%s4979_s25 + $0x18] sm:$0xff] }
 0x90b   : > { %v1523_v16 = vmul.f32 1.442695, %v1522_v15  ;;  %v2133_v15 = vld [vmem:[%s4939_s23 + $0x8] sm:$0xff] }
 0x90d   : > { %4450 = vpow2.f32 %v1523_v16 }
 0x917   : > { %v4451_v17 = vpop.eup %4450 }
 0x918   : > { %v1525_v18 = vsel %vm796_vm2, %v4451_v17, 0.0 }
 0x919   : > { %1526 = vadd.xlane.f32.xlu1 %v1525_v18 }
 0x9a6   : > { %v1527_v21 = vpop.xlane.xlu1 %1526 }
 0x9a7   : > { %4452 = vrcp.f32 %v1527_v21 }
 0x9b1   : > { %v4453_v24 = vpop.eup %4452 }
 0x9b2   : > { %v1529_v26 = vmul.f32 %v4453_v24, %v4451_v17  ;;  %v4309_v17 = vpack.c.bf16 %v2133_v15, %v2132_v14  ;;  %v3815_v24 = vld [vmem:[%s5298_s18] ss:$0 sm:$0xff] }
 0x9b3   : > { %v3840_v15 = vld [vmem:[%s5289_s9 + $0x40] sm:$0xff] }
 0x9b4   : > { %4079 = vmatmul.mubr.msk.f32.vlgmr.msra.gmra.mrb[6].mxu1 %vm796_vm2, %v1529_v26 }
 0x9b5   : > { %4298 = vmatpush3.bf16.msra.mxu1 %v4297_v25  ;;  %4094 = vmatprep.mubr.msk.f32.mxu1 %vm4561_vm0, %v4562_v6 }
 0x9b6   : > { %4299 = vmatprep.subr.bf16.mxu1 %v4560_v3 }
 0x9b9   : > { %4301 = vmatpush3.bf16.msra.mxu1 %v4300_v29 }
 0x9ba   : > { %4107 = vmatprep.subr.mxu1 %v4562_v6 }
 0x9bc   : > { %4095 = vmatmul.mubr.msk.f32.vlgmr.msra.gmra.mrb[8].mxu1 %vm721_vm1, %v4746_v8 }
 0x9bd   : > { %4109 = vmatprep.mubr.msk.f32.mxu1 %vm4561_vm0, %v4562_v6  ;;  %4108 = vmatpush3.msra.mxu1 %v3811_v50  ;;  %v3825_v50 = vld [vmem:[%s5289_s9 + $0x30] sm:$0xff] }
 0x9be   : > { %4308 = vmatprep.subr.bf16.mxu1 %v4560_v3 }
 0xa87   : > { %v1601_v31 = vpop.f32.mrb[6].mxu1 }
 0xa88   : > { %v4080_v32 = vpop.f32.mrb[7].mxu1  ;;  %4084 = vmatmul.mubr.msk.f32.vlgmr.msra.gmra.mrb[14].mxu0 %vm796_vm2, %v1601_v31 }
 0xa89   : > { %4098 = vmatpush3.xpose.msk.msra.mxu0 %vm796_vm2, %v3806_v30  ;;  %4099 = vmatprep.mubr.msk.f32.mxu0 %vm4561_vm0, %v4562_v6 }
 0xa8a   : > { %4102 = vmatprep.subr.mxu0 %v4562_v6 }
 0xa8f   : > { %v1762_v34 = vpop.f32.mrb[8].mxu1 }
 0xa90   : > { %v1763_v35 = vadd.f32 %v3804_v33, %v1762_v34  ;;  %v4096_v36 = vpop.f32.mrb[9].mxu1 }
 0xa92   : > { %4100 = vmatmul.mubr.msk.f32.vlgmr.msra.gmra.mrb[16].mxu0 %vm796_vm2, %v1763_v35 }
 0xa93   : > { %4104 = vmatprep.mubr.msk.f32.mxu0 %vm4561_vm0, %v4562_v6  ;;  %4103 = vmatpush3.msra.mxu0 %v3809_v49 }
 0xa94   : > { %4302 = vmatprep.subr.bf16.mxu0 %v4560_v3 }
 0xb5b   : > { %v1676_v37 = vpop.f32.mrb[14].mxu0 }
 0xb5c   : > { %v1681_v39 = vadd.f32 %v1680_v38, %v1676_v37  ;;  %v4085_v40 = vpop.f32.mrb[15].mxu0 }
 0xb5d   : > { %v2225_v40 = vld [vmem:[%s4979_s25] sm:$0xff] }
 0xb5e   : > { %1682 = vst.msk [vmem:[#allocation3] sm:$0xff] %vm721_vm1, %v1681_v39 }
 0xb65   : > { %v1840_v41 = vpop.f32.mrb[16].mxu0  ;;  %v2005_v57 = vld [vmem:[#allocation3] sm:$0xff] }
 0xb66   : > { %v4101_v42 = vpop.f32.mrb[17].mxu0  ;;  %v1844_v43 = vsel %vm796_vm2, %v1840_v41, -inf }
 0xb67   : > { %1845 = vmax.xlane.f32.xlu0 %v1844_v43  ;;  %v2300_v43 = vld [vmem:[%s5291_s11] sm:$0xff] }
 0xbf4   : > { %v1846_v44 = vpop.xlane.xlu0 %1845 }
 0xbf5   : > { %v1847_v45 = vsub.f32 %v1840_v41, %v1846_v44  ;;  %v2226_v41 = vld [vmem:[%s4979_s25 + $0x8] sm:$0xff] }
 0xbf6   : > { %v4313_v42 = vpack.c.bf16 %v2226_v41, %v2225_v40 }
 0xbf7   : > { %v1848_v46 = vmul.f32 1.442695, %v1847_v45  ;;  %v3823_v45 = vld [vmem:[%s5289_s9 + $0x20] sm:$0xff] }
 0xbf9   : > { %4454 = vpow2.f32 %v1848_v46  ;;  %v3824_v46 = vld [vmem:[%s5289_s9 + $0x28] sm:$0xff] }
 0xc03   : > { %v4455_v47 = vpop.eup %4454 }
 0xc04   : > { %v1850_v48 = vsel %vm796_vm2, %v4455_v47, 0.0 }
 0xc05   : > { %1851 = vadd.xlane.f32.xlu1 %v1850_v48  ;;  %v4316_v48 = vpack.c.bf16 %v3824_v46, %v3823_v45  ;;  %v3852_v46 = vld [vmem:[%s4979_s25 + $0x20] sm:$0xff] }
 0xc92   : > { %v1852_v51 = vpop.xlane.xlu1 %1851 }
 0xc93   : > { %4456 = vrcp.f32 %v1852_v51  ;;  %v3826_v51 = vld [vmem:[%s5289_s9 + $0x38] sm:$0xff] }
 0xc9d   : > { %v4457_v52 = vpop.eup %4456 }
 0xc9e   : > { %v1854_v53 = vmul.f32 %v4457_v52, %v4455_v47  ;;  %v4319_v52 = vpack.c.bf16 %v3826_v51, %v3825_v50  ;;  %v3857_v51 = vld [vmem:[%s5289_s9 + $0x60] sm:$0xff] }
 0xca0   : > { %4105 = vmatmul.mubr.msk.f32.vlgmr.msra.gmra.mrb[18].mxu0 %vm796_vm2, %v1854_v53  ;;  %v3830_v53 = vld [vmem:[%s4939_s23 + $0x10] sm:$0xff] }
 0xca1   : > { %4120 = vmatprep.mubr.msk.f32.mxu0 %vm4561_vm0, %v4562_v6 }
 0xd73   : > { %v1926_v54 = vpop.f32.mrb[18].mxu0 }
 0xd74   : > { %v4106_v55 = vpop.f32.mrb[19].mxu0  ;;  %4110 = vmatmul.mubr.msk.f32.vlgmr.msra.gmra.mrb[10].mxu1 %vm796_vm2, %v1926_v54  ;;  %v3831_v54 = vld [vmem:[%s4939_s23 + $0x18] sm:$0xff] }
 0xd75   : > { %4127 = vmatprep.mubr.msk.f32.mxu1 %vm4561_vm0, %v4562_v6  ;;  %4311 = vmatpush3.bf16.xpose.msk.msra.mxu1 %vm4946_vm3, %v4309_v17  ;;  %v4322_v55 = vpack.c.bf16 %v3831_v54, %v3830_v53  ;;  %v3841_v17 = vld [vmem:[%s5289_s9 + $0x48] sm:$0xff] }
 0xd76   : > { %4137 = vmatprep.subr.mxu1 %v4562_v6 }
 0xe47   : > { %v2001_v56 = vpop.f32.mrb[10].mxu1 }
 0xe48   : > { %v2006_v58 = vadd.f32 %v2005_v57, %v2001_v56  ;;  %v4111_v59 = vpop.f32.mrb[11].mxu1 }
 0xe4a   : > { %2007 = vst.msk [vmem:[#allocation3] sm:$0xff] %vm721_vm1, %v2006_v58  ;;  %v3828_v58 = vld [vmem:[%s5290_s10 + $0x1] ss:$0 sm:$0xff] }
 0xe51   : > { %v2008_v61 = vld [vmem:[#allocation3] sm:$0xff] }
 0xe52   : > { %v2016_v62 = vadd.f32 %v3813_v60, %v2008_v61 }
 0xe54   : > { %v2017_v63 = vadd.f32 %v2016_v62, %v4746_v8  ;;  %v2049_v8 = vld [vmem:[%s5289_s9 + $0x8] sm:$0xff] }
 0xe55   : > { %v4303_v10 = vpack.c.bf16 %v2049_v8, %v2048_v9 }
 0xe56   : > { %v2018_v0 = vsel %vm721_vm1, %v2017_v63, 0.0 }
 0xe57   : > { %2019 = vadd.xlane.f32.xlu0 %v2018_v0  ;;  %4304 = vmatpush3.bf16.msra.mxu0 %v4303_v10  ;;  %v3835_v10 = vld [vmem:[%s4979_s25 + $0x10] sm:$0xff] }
 0xe58   : > { %4305 = vmatprep.subr.bf16.mxu0 %v4560_v3  ;;  %v4326_v12 = vpack.c.bf16 %v3836_v11, %v3835_v10 }
 0xe5b   : > { %4307 = vmatpush3.bf16.msra.mxu0 %v4306_v13  ;;  %v3838_v13 = vld [vmem:[%s5291_s11 + $0x8] sm:$0xff] }
 0xe5c   : > { %4312 = vmatprep.subr.bf16.mxu0 %v4560_v3 }
 0xee4   : > { %v2020_v1 = vpop.xlane.xlu0 %2019 }
 0xee5   : > { %v2022_v2 = vmul.f32 0.03125, %v2020_v1 }
 0xee7   : > { %v2023_v4 = vsub.f32 %v2017_v63, %v2022_v2 }
 0xee9   : > { %v2024_v5 = vmul.f32 %v2023_v4, %v2023_v4 }
 0xeeb   : > { %v2025_v7 = vsel %vm721_vm1, %v2024_v5, 0.0 }
 0xeec   : > { %2026 = vadd.xlane.f32.xlu1 %v2025_v7 }
 0xf79   : > { %v2027_v18 = vpop.xlane.xlu1 %2026 }
 0xf7a   : > { %v2028_v19 = vmul.f32 0.03125, %v2027_v18 }
 0xf7c   : > { %v2029_v20 = vadd.f32 1e-05, %v2028_v19  ;;  %v4329_v19 = vpack.c.bf16 %v3841_v17, %v3840_v15 }
 0xf7e   : > { %4458 = vrsqrt.f32 %v2029_v20 }
 0xf88   : > { %v4459_v21 = vpop.eup %4458 }
 0xf89   : > { %v2031_v23 = vmul.f32 %v4459_v21, %v2023_v4  ;;  %v3842_v21 = vld [vmem:[%s5289_s9 + $0x50] sm:$0xff] }
 0xf8b   : > { %v2038_v25 = vmul.f32 %v3814_v22, %v2031_v23  ;;  %v3843_v22 = vld [vmem:[%s5289_s9 + $0x58] sm:$0xff] }
 0xf8c   : > { %v4332_v23 = vpack.c.bf16 %v3843_v22, %v3842_v21  ;;  %v3872_v21 = vld [vmem:[%s5291_s11 + $0x18] sm:$0xff] }
 0xf8d   : > { %v2045_v26 = vadd.f32 %v3815_v24, %v2038_v25  ;;  %v3847_v24 = vld [vmem:[%s4939_s23 + $0x20] sm:$0xff]  ;;  %v3848_v25 = vld [vmem:[%s4939_s23 + $0x28] sm:$0xff] }
 0xf8f   : > { %2046 = vst.msk [vmem:[#allocation2] sm:$0xff] %vm721_vm1, %v2045_v26  ;;  %v4335_v26 = vpack.c.bf16 %v3848_v25, %v3847_v24 }
 0xf96   : > { %v4960_v27 = vld [vmem:[#allocation2] sm:$0xff] }
 0xf97   : > { %4121 = vmatmul.mubr.msk.f32.vlgmr.msra.gmra.mrb[20].mxu0 %vm721_vm1, %v4960_v27 }
 0xf98   : > { %4134 = vmatprep.mubr.msk.f32.mxu0 %vm4561_vm0, %v4562_v6  ;;  %4314 = vmatpush3.bf16.msra.mxu0 %v4313_v42 }
 0xf99   : > { %4315 = vmatprep.subr.bf16.mxu0 %v4560_v3 }
0x106a   : > { %v2128_v29 = vpop.f32.mrb[20].mxu0 }
0x106b   : > { %v2129_v30 = vadd.f32 %v3816_v28, %v2128_v29  ;;  %v4122_v31 = vpop.f32.mrb[21].mxu0 }
0x106d   : > { %4128 = vmatmul.mubr.msk.f32.vlgmr.msra.gmra.mrb[12].mxu1 %vm796_vm2, %v2129_v30  ;;  %v3845_v30 = vld [vmem:[%s5290_s10 + $0x2] ss:$0 sm:$0xff] }
0x106e   : > { %4139 = vmatprep.mubr.msk.f32.mxu1 %vm4561_vm0, %v4562_v6  ;;  %4138 = vmatpush3.msra.mxu1 %v2300_v43 }
0x106f   : > { %4321 = vmatprep.subr.bf16.mxu1 %v4560_v3 }
0x1140   : > { %v2209_v32 = vpop.f32.mrb[12].mxu1 }
0x1141   : > { %v4129_v33 = vpop.f32.mrb[13].mxu1  ;;  %v2214_v34 = vsel %vm2213_vm4, %v2209_v32, -inf }
0x1142   : > { %2215 = vmax.xlane.f32.xlu0 %v2214_v34 }
0x11cf   : > { %v2216_v35 = vpop.xlane.xlu0 %2215 }
0x11d0   : > { %v2217_v36 = vsub.f32 %v2209_v32, %v2216_v35 }
0x11d2   : > { %v2218_v37 = vmul.f32 1.442695, %v2217_v36 }
0x11d4   : > { %4460 = vpow2.f32 %v2218_v37 }
0x11de   : > { %v4461_v38 = vpop.eup %4460 }
0x11df   : > { %v2220_v39 = vsel %vm2213_vm4, %v4461_v38, 0.0 }
0x11e0   : > { %2221 = vadd.xlane.f32.xlu1 %v2220_v39 }
0x126d   : > { %v2222_v44 = vpop.xlane.xlu1 %2221 }
0x126e   : > { %4462 = vrcp.f32 %v2222_v44 }
0x1278   : > { %v4463_v47 = vpop.eup %4462 }
0x1279   : > { %v2224_v49 = vmul.f32 %v4463_v47, %v4461_v38  ;;  %v3853_v47 = vld [vmem:[%s4979_s25 + $0x28] sm:$0xff] }
0x127b   : > { %4135 = vmatmul.mubr.msk.f32.vlgmr.msra.gmra.mrb[22].mxu0 %vm2213_vm4, %v2224_v49  ;;  %v3855_v49 = vld [vmem:[%s5291_s11 + $0x10] sm:$0xff] }
0x127c   : > { %4317 = vmatpush3.bf16.msra.mxu0 %v4316_v48  ;;  %4150 = vmatprep.mubr.msk.f32.mxu0 %vm4561_vm0, %v4562_v6  ;;  %v4339_v48 = vpack.c.bf16 %v3853_v47, %v3852_v46  ;;  %v3490_v46 = vld [vmem:[%s5295_s15] sm:$0xff]  ;;  %v3491_v47 = vld [vmem:[%s5295_s15 + $0x8] sm:$0xff] }
0x127d   : > { %4318 = vmatprep.subr.bf16.mxu0 %v4560_v3 }
0x1280   : > { %4320 = vmatpush3.bf16.msra.mxu0 %v4319_v52  ;;  %v3858_v52 = vld [vmem:[%s5289_s9 + $0x68] sm:$0xff] }
0x1281   : > { %4325 = vmatprep.subr.bf16.mxu0 %v4560_v3  ;;  %v4342_v54 = vpack.c.bf16 %v3858_v52, %v3857_v51  ;;  %v3494_v52 = vld [vmem:[%s5295_s15 + $0x20] sm:$0xff] }
0x1283   : > { %4151 = vmatmul.mubr.msk.f32.vlgmr.msra.gmra.mrb[24].mxu0 %vm721_vm1, %v4960_v27 }
0x1284   : > { %4164 = vmatprep.mubr.msk.f32.mxu0 %vm4561_vm0, %v4562_v6  ;;  %4327 = vmatpush3.bf16.msra.mxu0 %v4326_v12 }
0x1285   : > { %4328 = vmatprep.subr.bf16.mxu0 %v4560_v3 }
0x134e   : > { %v2296_v56 = vpop.f32.mrb[22].mxu0 }
0x134f   : > { %v4136_v57 = vpop.f32.mrb[23].mxu0  ;;  %4140 = vmatmul.mubr.msk.f32.vlgmr.msra.gmra.mrb[14].mxu1 %vm796_vm2, %v2296_v56  ;;  %v3859_v56 = vld [vmem:[%s5289_s9 + $0x70] sm:$0xff] }
0x1350   : > { %4324 = vmatpush3.bf16.xpose.msk.msra.mxu1 %vm4946_vm3, %v4322_v55  ;;  %4157 = vmatprep.mubr.msk.f32.mxu1 %vm4561_vm0, %v4562_v6  ;;  %v3860_v57 = vld [vmem:[%s5289_s9 + $0x78] sm:$0xff] }
0x1351   : > { %4167 = vmatprep.subr.mxu1 %v4562_v6 }
0x1356   : > { %v2454_v59 = vpop.f32.mrb[24].mxu0 }
0x1357   : > { %v2455_v60 = vadd.f32 %v3828_v58, %v2454_v59  ;;  %v4152_v61 = vpop.f32.mrb[25].mxu0  ;;  %v4345_v58 = vpack.c.bf16 %v3860_v57, %v3859_v56  ;;  %v3864_v59 = vld [vmem:[%s4939_s23 + $0x30] sm:$0xff]  ;;  %v3497_v56 = vld [vmem:[%s5295_s15 + $0x38] sm:$0xff] }
0x1359   : > { %4158 = vmatmul.mubr.msk.f32.vlgmr.msra.gmra.mrb[16].mxu1 %vm796_vm2, %v2455_v60  ;;  %v3865_v60 = vld [vmem:[%s4939_s23 + $0x38] sm:$0xff]  ;;  %s4480_s23 = scalar_lea.vmem %s5234_s2, 128 }
0x135a   : > { %4169 = vmatprep.mubr.msk.f32.mxu1 %vm4561_vm0, %v4562_v6  ;;  %4168 = vmatpush3.msra.mxu1 %v3838_v13  ;;  %v4348_v61 = vpack.c.bf16 %v3865_v60, %v3864_v59  ;;  %v3499_v59 = vld [vmem:[%s5295_s15 + $0x48] sm:$0xff]  ;;  %p4481_p12 = scmp.ne.s32.totalorder %s5234_s2, %s4480_s23  ;;  %p4488_p2 = scmp.lt.s32.totalorder %s4486_s26, %s4480_s23 }
0x135b   : > { %4334 = vmatprep.subr.bf16.mxu1 %v4560_v3 }
0x135c   : > { %p4482_p13 = pnand %p4481_p12, %p4704_p4  ;;  %p4489_p3 = por %p4488_p2, %p4487_p1 }
0x135e   : > { %p4483_p0 = pneg %p4482_p13 }
0x1360   : > { %p4490_p5 = pnand %p4489_p3, %p4483_p0 }
0x1422   : > { %v2370_v62 = vpop.f32.mrb[14].mxu1 }
0x1423   : > { %2374 = vst.msk [vmem:[#allocation3] sm:$0xff] %vm721_vm1, %v2370_v62  ;;  %v4141_v63 = vpop.f32.mrb[15].mxu1 }
0x142a   : > { %v2702_v35 = vld [vmem:[#allocation3] sm:$0xff] }
0x142c   : > { %v2536_v0 = vpop.f32.mrb[16].mxu1 }
0x142d   : > { %v4159_v1 = vpop.f32.mrb[17].mxu1  ;;  %v2540_v2 = vsel %vm2213_vm4, %v2536_v0, -inf }
0x142e   : > { %2541 = vmax.xlane.f32.xlu0 %v2540_v2 }
0x14bb   : > { %v2542_v4 = vpop.xlane.xlu0 %2541 }
0x14bc   : > { %v2543_v5 = vsub.f32 %v2536_v0, %v2542_v4  ;;  %v3862_v0 = vld [vmem:[%s5290_s10 + $0x3] ss:$0 sm:$0xff] }
0x14be   : > { %v2544_v7 = vmul.f32 1.442695, %v2543_v5 }
0x14c0   : > { %4464 = vpow2.f32 %v2544_v7 }
0x14ca   : > { %v4465_v9 = vpop.eup %4464 }
0x14cb   : > { %v2546_v8 = vsel %vm2213_vm4, %v4465_v9, 0.0 }
0x14cc   : > { %2547 = vadd.xlane.f32.xlu1 %v2546_v8 }
0x1559   : > { %v2548_v14 = vpop.xlane.xlu1 %2547 }
0x155a   : > { %4466 = vrcp.f32 %v2548_v14 }
0x1564   : > { %v4467_v18 = vpop.eup %4466 }
0x1565   : > { %v2550_v20 = vmul.f32 %v4467_v18, %v4465_v9  ;;  %v3869_v18 = vld [vmem:[%s4979_s25 + $0x30] sm:$0xff] }
0x1567   : > { %4165 = vmatmul.mubr.msk.f32.vlgmr.msra.gmra.mrb[26].mxu0 %vm2213_vm4, %v2550_v20 }
0x1568   : > { %4330 = vmatpush3.bf16.msra.mxu0 %v4329_v19  ;;  %4180 = vmatprep.mubr.msk.f32.mxu0 %vm4561_vm0, %v4562_v6  ;;  %v3870_v19 = vld [vmem:[%s4979_s25 + $0x38] sm:$0xff] }
0x1569   : > { %4331 = vmatprep.subr.bf16.mxu0 %v4560_v3  ;;  %v4352_v20 = vpack.c.bf16 %v3870_v19, %v3869_v18 }
0x156c   : > { %4333 = vmatpush3.bf16.msra.mxu0 %v4332_v23 }
0x156d   : > { %4338 = vmatprep.subr.bf16.mxu0 %v4560_v3 }
0x156f   : > { %4181 = vmatmul.mubr.msk.f32.vlgmr.msra.gmra.mrb[28].mxu0 %vm721_vm1, %v4960_v27 }
0x1570   : > { %4194 = vmatprep.mubr.msk.f32.mxu0 %vm4561_vm0, %v4562_v6  ;;  %4340 = vmatpush3.bf16.msra.mxu0 %v4339_v48  ;;  %v3492_v48 = vld [vmem:[%s5295_s15 + $0x10] sm:$0xff] }
0x1571   : > { %4341 = vmatprep.subr.bf16.mxu0 %v4560_v3 }
0x163a   : > { %v2623_v28 = vpop.f32.mrb[26].mxu0 }
0x163b   : > { %v4166_v29 = vpop.f32.mrb[27].mxu0  ;;  %4170 = vmatmul.mubr.msk.f32.vlgmr.msra.gmra.mrb[18].mxu1 %vm796_vm2, %v2623_v28 }
0x163c   : > { %4337 = vmatpush3.bf16.xpose.msk.msra.mxu1 %vm4946_vm3, %v4335_v26  ;;  %4187 = vmatprep.mubr.msk.f32.mxu1 %vm4561_vm0, %v4562_v6 }
0x163d   : > { %4197 = vmatprep.subr.mxu1 %v4562_v6 }
0x1642   : > { %v2784_v31 = vpop.f32.mrb[28].mxu0 }
0x1643   : > { %v2785_v32 = vadd.f32 %v3845_v30, %v2784_v31  ;;  %v4182_v33 = vpop.f32.mrb[29].mxu0 }
0x1645   : > { %4188 = vmatmul.mubr.msk.f32.vlgmr.msra.gmra.mrb[20].mxu1 %vm796_vm2, %v2785_v32  ;;  %v3874_v32 = vld [vmem:[%s5292_s12] ss:$0 sm:$0xff] }
0x1646   : > { %4199 = vmatprep.mubr.msk.f32.mxu1 %vm4561_vm0, %v4562_v6  ;;  %4198 = vmatpush3.msra.mxu1 %v3855_v49  ;;  %v4361_v49 = vpack.c.bf16 %v3491_v47, %v3490_v46 }
0x1647   : > { %4347 = vmatprep.subr.bf16.mxu1 %v4560_v3 }
0x170e   : > { %v2698_v34 = vpop.f32.mrb[18].mxu1 }
0x170f   : > { %v2703_v36 = vadd.f32 %v2702_v35, %v2698_v34  ;;  %v4171_v37 = vpop.f32.mrb[19].mxu1 }
0x1711   : > { %2704 = vst.msk [vmem:[#allocation3] sm:$0xff] %vm721_vm1, %v2703_v36 }
0x1718   : > { %v2866_v38 = vpop.f32.mrb[20].mxu1  ;;  %v3032_v16 = vld [vmem:[#allocation3] sm:$0xff] }
0x1719   : > { %v4189_v39 = vpop.f32.mrb[21].mxu1  ;;  %v2870_v40 = vsel %vm2213_vm4, %v2866_v38, -inf }
0x171a   : > { %2871 = vmax.xlane.f32.xlu0 %v2870_v40 }
0x17a7   : > { %v2872_v41 = vpop.xlane.xlu0 %2871 }
0x17a8   : > { %v2873_v42 = vsub.f32 %v2866_v38, %v2872_v41  ;;  %v3405_v41 = vld [vmem:[%s5293_s13] sm:$0xff] }
0x17aa   : > { %v2874_v43 = vmul.f32 1.442695, %v2873_v42  ;;  %v3406_v42 = vld [vmem:[%s5293_s13 + $0x8] sm:$0xff] }
0x17ac   : > { %4468 = vpow2.f32 %v2874_v43  ;;  %v4355_v43 = vpack.c.bf16 %v3406_v42, %v3405_v41 }
0x17b6   : > { %v4469_v44 = vpop.eup %4468 }
0x17b7   : > { %v2876_v45 = vsel %vm2213_vm4, %v4469_v44, 0.0 }
0x17b8   : > { %2877 = vadd.xlane.f32.xlu1 %v2876_v45 }
0x1845   : > { %v2878_v50 = vpop.xlane.xlu1 %2877 }
0x1846   : > { %4470 = vrcp.f32 %v2878_v50  ;;  %v3493_v50 = vld [vmem:[%s5295_s15 + $0x18] sm:$0xff] }
0x1847   : > { %v4364_v51 = vpack.c.bf16 %v3493_v50, %v3492_v48 }
0x1850   : > { %v4471_v53 = vpop.eup %4470 }
0x1851   : > { %v2880_v55 = vmul.f32 %v4471_v53, %v4469_v44  ;;  %v3408_v44 = vld [vmem:[%s5293_s13 + $0x18] sm:$0xff]  ;;  %v3495_v53 = vld [vmem:[%s5295_s15 + $0x28] sm:$0xff] }
0x1853   : > { %4195 = vmatmul.mubr.msk.f32.vlgmr.msra.gmra.mrb[30].mxu0 %vm2213_vm4, %v2880_v55  ;;  %v3496_v55 = vld [vmem:[%s5295_s15 + $0x30] sm:$0xff] }
0x1854   : > { %4343 = vmatpush3.bf16.msra.mxu0 %v4342_v54  ;;  %4210 = vmatprep.mubr.msk.f32.mxu0 %vm4561_vm0, %v4562_v6  ;;  %v4367_v54 = vpack.c.bf16 %v3495_v53, %v3494_v52  ;;  %v4370_v57 = vpack.c.bf16 %v3497_v56, %v3496_v55 }
0x1855   : > { %4344 = vmatprep.subr.bf16.mxu0 %v4560_v3 }
0x1858   : > { %4346 = vmatpush3.bf16.msra.mxu0 %v4345_v58  ;;  %v3498_v58 = vld [vmem:[%s5295_s15 + $0x40] sm:$0xff] }
0x1859   : > { %4351 = vmatprep.subr.bf16.mxu0 %v4560_v3  ;;  %v4373_v60 = vpack.c.bf16 %v3499_v59, %v3498_v58 }
0x185b   : > { %4211 = vmatmul.mubr.msk.f32.vlgmr.msra.gmra.mrb[32].mxu0 %vm721_vm1, %v4960_v27 }
0x185c   : > { %4224 = vmatprep.mubr.msk.f32.mxu0 %vm4561_vm0, %v4562_v6  ;;  %4353 = vmatpush3.bf16.msra.mxu0 %v4352_v20 }
0x185d   : > { %4354 = vmatprep.subr.bf16.mxu0 %v4560_v3 }
0x1926   : > { %v2953_v62 = vpop.f32.mrb[30].mxu0 }
0x1927   : > { %v4196_v63 = vpop.f32.mrb[31].mxu0  ;;  %4200 = vmatmul.mubr.msk.f32.vlgmr.msra.gmra.mrb[22].mxu1 %vm796_vm2, %v2953_v62  ;;  %v3501_v62 = vld [vmem:[%s5295_s15 + $0x58] sm:$0xff] }
0x1928   : > { %4350 = vmatpush3.bf16.xpose.msk.msra.mxu1 %vm4946_vm3, %v4348_v61  ;;  %4217 = vmatprep.mubr.msk.f32.mxu1 %vm4561_vm0, %v4562_v6  ;;  %v3500_v61 = vld [vmem:[%s5295_s15 + $0x50] sm:$0xff] }
0x1929   : > { %4227 = vmatprep.subr.mxu1 %v4562_v6  ;;  %v4376_v63 = vpack.c.bf16 %v3501_v62, %v3500_v61 }
0x192e   : > { %v3114_v1 = vpop.f32.mrb[32].mxu0 }
0x192f   : > { %v3115_v2 = vadd.f32 %v3862_v0, %v3114_v1  ;;  %v4212_v4 = vpop.f32.mrb[33].mxu0  ;;  %v3502_v0 = vld [vmem:[%s5295_s15 + $0x60] sm:$0xff]  ;;  %v3503_v1 = vld [vmem:[%s5295_s15 + $0x68] sm:$0xff] }
0x1931   : > { %4218 = vmatmul.mubr.msk.f32.vlgmr.msra.gmra.mrb[24].mxu1 %vm796_vm2, %v3115_v2  ;;  %v4379_v2 = vpack.c.bf16 %v3503_v1, %v3502_v0 }
0x1932   : > { %4229 = vmatprep.mubr.msk.f32.mxu1 %vm4561_vm0, %v4562_v6  ;;  %4228 = vmatpush3.msra.mxu1 %v3872_v21 }
0x1933   : > { %4360 = vmatprep.subr.bf16.mxu1 %v4560_v3 }
0x19fa   : > { %v3028_v5 = vpop.f32.mrb[22].mxu1 }
0x19fb   : > { %v3033_v7 = vadd.f32 %v3032_v16, %v3028_v5  ;;  %v4201_v9 = vpop.f32.mrb[23].mxu1 }
0x19fc   : > { %v3875_v9 = vld [vmem:[%s5297_s17 + $0x1] ss:$0 sm:$0xff] }
0x19fd   : > { %3034 = vst.msk [vmem:[#allocation3] sm:$0xff] %vm721_vm1, %v3033_v7 }
0x1a04   : > { %v3196_v8 = vpop.f32.mrb[24].mxu1  ;;  %v3362_v29 = vld [vmem:[#allocation3] sm:$0xff] }
0x1a05   : > { %v4219_v10 = vpop.f32.mrb[25].mxu1  ;;  %v3200_v11 = vsel %vm2213_vm4, %v3196_v8, -inf }
0x1a06   : > { %3201 = vmax.xlane.f32.xlu0 %v3200_v11  ;;  %v3876_v10 = vld [vmem:[%s5298_s18 + $0x1] ss:$0 sm:$0xff] }
0x1a93   : > { %v3202_v12 = vpop.xlane.xlu0 %3201 }
0x1a94   : > { %v3203_v13 = vsub.f32 %v3196_v8, %v3202_v12 }
0x1a96   : > { %v3204_v14 = vmul.f32 1.442695, %v3203_v13 }
0x1a98   : > { %4472 = vpow2.f32 %v3204_v14  ;;  %v3505_v14 = vld [vmem:[%s5295_s15 + $0x78] sm:$0xff] }
0x1aa2   : > { %v4473_v15 = vpop.eup %4472 }
0x1aa3   : > { %v3206_v17 = vsel %vm2213_vm4, %v4473_v15, 0.0 }
0x1aa4   : > { %3207 = vadd.xlane.f32.xlu1 %v3206_v17  ;;  %v3877_v17 = vld [vmem:[%s5294_s14] ss:$0 sm:$0xff] }
0x1b31   : > { %v3208_v22 = vpop.xlane.xlu1 %3207 }
0x1b32   : > { %4474 = vrcp.f32 %v3208_v22 }
0x1b3c   : > { %v4475_v23 = vpop.eup %4474 }
0x1b3d   : > { %v3210_v24 = vmul.f32 %v4475_v23, %v4473_v15 }
0x1b3f   : > { %4225 = vmatmul.mubr.msk.f32.vlgmr.msra.gmra.mrb[34].mxu0 %vm2213_vm4, %v3210_v24  ;;  %v3879_v24 = vld [vmem:[%s5296_s16] ss:$0 sm:$0xff] }
0x1b40   : > { %4240 = vmatprep.mubr.msk.f32.mxu0 %vm4561_vm0, %v4562_v6  ;;  %4356 = vmatpush3.bf16.msra.mxu0 %v4355_v43 }
0x1b41   : > { %4357 = vmatprep.subr.bf16.mxu0 %v4560_v3 }
0x1c12   : > { %v3283_v25 = vpop.f32.mrb[34].mxu0 }
0x1c13   : > { %v4226_v26 = vpop.f32.mrb[35].mxu0  ;;  %4230 = vmatmul.mubr.msk.f32.vlgmr.msra.gmra.mrb[26].mxu1 %vm796_vm2, %v3283_v25 }
0x1c14   : > { %4275 = vmatprep.mubr.msk.f32.mxu1 %vm4561_vm0, %v4562_v6  ;;  %4362 = vmatpush3.bf16.msra.mxu1 %v4361_v49 }
0x1c15   : > { %4363 = vmatprep.subr.bf16.mxu1 %v4560_v3 }
0x1c18   : > { %4365 = vmatpush3.bf16.msra.mxu1 %v4364_v51 }
0x1c19   : > { %4366 = vmatprep.subr.bf16.mxu1 %v4560_v3 }
0x1c1c   : > { %4368 = vmatpush3.bf16.msra.mxu1 %v4367_v54 }
0x1c1d   : > { %4369 = vmatprep.subr.bf16.mxu1 %v4560_v3 }
0x1c20   : > { %4371 = vmatpush3.bf16.msra.mxu1 %v4370_v57 }
0x1c21   : > { %4372 = vmatprep.subr.bf16.mxu1 %v4560_v3 }
0x1c24   : > { %4374 = vmatpush3.bf16.msra.mxu1 %v4373_v60 }
0x1c25   : > { %4375 = vmatprep.subr.bf16.mxu1 %v4560_v3 }
0x1c28   : > { %4377 = vmatpush3.bf16.msra.mxu1 %v4376_v63 }
0x1c29   : > { %4378 = vmatprep.subr.bf16.mxu1 %v4560_v3 }
0x1c2c   : > { %4380 = vmatpush3.bf16.msra.mxu1 %v4379_v2 }
0x1c2d   : > { %4381 = vmatprep.subr.bf16.mxu1 %v4560_v3  ;;  %v3504_v3 = vld [vmem:[%s5295_s15 + $0x70] sm:$0xff] }
0x1c2e   : > { %v4382_v15 = vpack.c.bf16 %v3505_v14, %v3504_v3 }
0x1c30   : > { %4383 = vmatpush3.bf16.msra.mxu1 %v4382_v15 }
0x1ce6   : > { %v3358_v28 = vpop.f32.mrb[26].mxu1 }
0x1ce7   : > { %v3363_v30 = vadd.f32 %v3362_v29, %v3358_v28  ;;  %v4231_v31 = vpop.f32.mrb[27].mxu1 }
0x1ce9   : > { %3364 = vst.msk [vmem:[#allocation3] sm:$0xff] %vm721_vm1, %v3363_v30 }
0x1cf0   : > { %v3365_v33 = vld [vmem:[#allocation3] sm:$0xff] }
0x1cf1   : > { %v3373_v34 = vadd.f32 %v3874_v32, %v3365_v33 }
0x1cf3   : > { %v3375_v35 = vadd.f32 %v3373_v34, %v4960_v27  ;;  %v3407_v27 = vld [vmem:[%s5293_s13 + $0x10] sm:$0xff] }
0x1cf4   : > { %v4358_v45 = vpack.c.bf16 %v3408_v44, %v3407_v27 }
0x1cf5   : > { %v3376_v36 = vsel %vm721_vm1, %v3375_v35, 0.0 }
0x1cf6   : > { %3377 = vadd.xlane.f32.xlu0 %v3376_v36  ;;  %4359 = vmatpush3.bf16.msra.mxu0 %v4358_v45 }
0x1d83   : > { %v3378_v37 = vpop.xlane.xlu0 %3377 }
0x1d84   : > { %v3379_v38 = vmul.f32 0.03125, %v3378_v37 }
0x1d86   : > { %v3380_v6 = vsub.f32 %v3375_v35, %v3379_v38 }
0x1d88   : > { %v3381_v39 = vmul.f32 %v3380_v6, %v3380_v6 }
0x1d8a   : > { %v3382_v40 = vsel %vm721_vm1, %v3381_v39, 0.0 }
0x1d8b   : > { %3383 = vadd.xlane.f32.xlu1 %v3382_v40  ;;  %v3881_v40 = vld [vmem:[%s5298_s18 + $0x2] ss:$0 sm:$0xff] }
0x1e18   : > { %v3384_v4 = vpop.xlane.xlu1 %3383 }
0x1e19   : > { %v3385_v5 = vmul.f32 0.03125, %v3384_v4 }
0x1e1b   : > { %v3386_v16 = vadd.f32 1e-05, %v3385_v5 }
0x1e1d   : > { %4476 = vrsqrt.f32 %v3386_v16 }
0x1e27   : > { %v4477_v7 = vpop.eup %4476 }
0x1e28   : > { %v3388_v8 = vmul.f32 %v4477_v7, %v3380_v6  ;;  %v3880_v6 = vld [vmem:[%s5297_s17 + $0x2] ss:$0 sm:$0xff] }
0x1e2a   : > { %v3395_v11 = vmul.f32 %v3875_v9, %v3388_v8 }
0x1e2c   : > { %v3402_v12 = vadd.f32 %v3876_v10, %v3395_v11 }
0x1e2e   : > { %3403 = vst.msk [vmem:[#allocation2] sm:$0xff] %vm721_vm1, %v3402_v12 }
0x1e35   : > { %v3404_v13 = vld [vmem:[#allocation2] sm:$0xff] }
0x1e36   : > { %4241 = vmatmul.mubr.msk.f32.vlgmr.msra.gmra.mrb[36].mxu0 %vm721_vm1, %v3404_v13 }
0x1f09   : > { %v3485_v18 = vpop.f32.mrb[36].mxu0 }
0x1f0a   : > { %v3486_v19 = vadd.f32 %v3877_v17, %v3485_v18  ;;  %v4242_v20 = vpop.f32.mrb[37].mxu0 }
0x1f0c   : > { %v3489_v21 = vmax.f32 %v3486_v19, 0.0 }
0x1f0e   : > { %4276 = vmatmul.mubr.f32.vlgmr.msra.gmra.mrb[28].mxu1 %v3489_v21 }
0x1fe1   : > { %v3572_v22 = vpop.f32.mrb[28].mxu1 }
0x1fe2   : > { %3576 = vst.msk [vmem:[#allocation3] sm:$0xff] %vm721_vm1, %v3572_v22  ;;  %v4277_v23 = vpop.f32.mrb[29].mxu1 }
0x1fe9   : > { %v3577_v25 = vld [vmem:[#allocation3] sm:$0xff] }
0x1fea   : > { %v3585_v26 = vadd.f32 %v3879_v24, %v3577_v25 }
0x1fec   : > { %v3587_v28 = vadd.f32 %v3585_v26, %v3404_v13 }
0x1fee   : > { %v3588_v29 = vsel %vm721_vm1, %v3587_v28, 0.0 }
0x1fef   : > { %3589 = vadd.xlane.f32.xlu0 %v3588_v29 }
0x207c   : > { %v3590_v30 = vpop.xlane.xlu0 %3589 }
0x207d   : > { %v3591_v31 = vmul.f32 0.03125, %v3590_v30 }
0x207f   : > { %v3592_v32 = vsub.f32 %v3587_v28, %v3591_v31 }
0x2081   : > { %v3593_v33 = vmul.f32 %v3592_v32, %v3592_v32 }
0x2083   : > { %v3594_v34 = vsel %vm721_vm1, %v3593_v33, 0.0 }
0x2084   : > { %3595 = vadd.xlane.f32.xlu1 %v3594_v34 }
0x2111   : > { %v3596_v35 = vpop.xlane.xlu1 %3595 }
0x2112   : > { %v3597_v36 = vmul.f32 0.03125, %v3596_v35 }
0x2114   : > { %v3598_v37 = vadd.f32 1e-05, %v3597_v36 }
0x2116   : > { %4478 = vrsqrt.f32 %v3598_v37 }
0x2120   : > { %v4479_v38 = vpop.eup %4478 }
0x2121   : > { %v3600_v39 = vmul.f32 %v4479_v38, %v3592_v32 }
0x2123   : > { %v3607_v41 = vmul.f32 %v3880_v6, %v3600_v39 }
0x2125   : > { %v3614_v42 = vadd.f32 %v3881_v40, %v3607_v41 }
0x2127   : > { %3615 = vst.msk [vmem:[%s675_s0] sm:$0xff] %vm721_vm1, %v3614_v42 }
0x2128   : > { %4493 = shalt.err (!%p4490_p5)
}
0x2129   : > { %s4494_s20 = scalar_lea.hbm %s5232_s4, 128  ;;  %s4498_s0 = scalar_lea.hbm %s5299_s19, 256 }
0x212a   : > { %p4495_p6 = scmp.ne.s32.totalorder %s5232_s4, %s4494_s20  ;;  %p4499_p10 = scmp.lt.u32.totalorder %s5232_s4, %s5299_s19 }
0x212b   : > { %p4500_p11 = scmp.lt.u32.totalorder %s4498_s0, %s4494_s20  ;;  %p4502_p13 = scmp.lt.u32.totalorder %s4494_s20, %s5232_s4 }
0x212c   : > { %p4496_p7 = pnand %p4495_p6, %p4704_p4 }
0x212d   : > { %p4501_p12 = por %p4500_p11, %p4499_p10 }
0x212e   : > { %p4497_p9 = pneg %p4496_p7 }
0x212f   : > { %p4503_p0 = por %p4502_p13, %p4501_p12 }
0x2131   : > { %p4504_p1 = pnand %p4503_p0, %p4497_p9 }
0x2133   : > { %4507 = shalt.err (!%p4504_p1)
}
0x2134   : > { %4384 = dma.vmem_to_hbm [thread:$0]  (%p4704_p4), %s5234_s2, 128, %s5232_s4, %s3617_s29  }
0x2135 PF: > { %s5325_s23 = sld [smem:[#allocation7_spill]]  ;;  %p4390_p2 = scmp.ge.s32.totalorder %s4558_s22, 2 }
0x2137   : > { %p4387_p3 = pnand %p4390_p2, %p4711_p8 }
0x213b   : > { %s3643_s28 = sand.u32 1, %s5325_s23  }
0x213c   : > { %s3644_s26 = scalar_lea.sflag [#allocation5], %s3643_s28 }
0x213d   : > { %4533 = dma.done.wait (!%p4387_p3), %s3644_s26, 128  }
0x213e   : > { %4535 = vsyncadd (!%p4387_p3), %s3644_s26, 4294967168  ;;  %s32_s22 = sadd.s32 1, %s4558_s22   ;;  %s5327_s20 = sld [smem:[#allocation8_spill]] }
0x213f   : > { %p29_p5 = scmp.ge.s32.totalorder %s32_s22, 4   ;;  %s5328_s3 = sld [smem:[#allocation12_spill]] }
0x2140   : > { %s5329_s21 = sld [smem:[#allocation9_spill]]  ;;  %s5330_s1 = sld [smem:[#allocation10_spill]] }
0x2141   : > { %s5331_s0 = smov %s4542_s30  ;;  %31 = sbr.rel (!%p29_p5) target bundleno = 10 (0xa), region = 173 }
0x2144   : > { %s5332_s30 = smov %s5327_s20 }
0x2145   : > { %s5333_s20 = smov %s5328_s3 }
0x2148   :  { %3649 = vsyncpa [#allocation5], 1 }
0x2149   :  { %3651 = vsyncpa [#allocation5 + $0x1], 1 }

</bundles_post_ra>
